<compile_context>
chip_gen: v6e
topology: v6e:2x2x1
jax: 0.10.0
libtpu: 0.0.40
codegen_flags: <defaults>
</compile_context>

<pallas_src>
import functools

import jax
import jax.numpy as jnp
import numpy as np
from jax.experimental import pallas as pl
from jax.experimental.pallas import tpu as pltpu


def _round_up(x, m):
    return ((x + m - 1) // m) * m


def _rnn_fused_kernel(ids_ref, wih_ref, whh_ref, brnn_ref, wlin_ref, blin_ref,
                      h0_ref, logits_ref, hfin_ref, x_all, y_all,
                      *, seq_len, batch):
    """Single-invocation fused RNN forward.

    ids_ref    : SMEM (T*B,) int32   token ids, time-major (scalar prefetch)
    wih_ref    : VMEM (V, 1, H_pad)  rows of W_ih^T (embedding table)
    whh_ref    : VMEM (H_pad, H_pad) hidden->hidden weight (transposed, zero-padded)
    brnn_ref   : VMEM (B_pad, H_pad) b_ih + b_hh, pre-broadcast
    wlin_ref   : VMEM (H_pad, V_pad) decoder weight (transposed, zero-padded)
    blin_ref   : VMEM (1, V_pad)     decoder bias (zero-padded)
    h0_ref     : VMEM (B_pad, H_pad) initial hidden state (zero-padded)
    logits_ref : VMEM (T*B_pad, V_pad) out: all logits, lane-dense
    hfin_ref   : VMEM (B_pad, H_pad)   out: final hidden state
    x_all      : VMEM scratch (T, B_pad, H_pad) gathered input contributions
    y_all      : VMEM scratch (T, B_pad, H_pad) hidden states for the decoder
    """
    Bp = x_all.shape[1]
    Hp = x_all.shape[2]

    # --- 1) Embedding gather (replaces the one-hot matmul). Gathers are independent
    #        of the recurrence, so do them up front, off the serial h-chain.
    x_all[...] = jnp.zeros_like(x_all)          # padded batch rows / padded H cols = 0
    for t in range(seq_len):                    # static unroll: T*B tiny-row copies
        for b in range(batch):
            tok = ids_ref[t * batch + b]        # dynamic scalar from SMEM
            x_all[t, b:b + 1, :] = wih_ref[tok]  # (1, H_pad) row of W_ih^T

    # --- 2) Recurrence: in-kernel loop, weights resident, one matmul per step.
    whh = whh_ref[...]
    bias = brnn_ref[...]                        # already (B_pad, H_pad): no re-broadcast

    def step(t, h_prev):
        h_new = jnp.tanh(
            x_all[t]
            + jnp.dot(h_prev, whh, preferred_element_type=jnp.float32)
            + bias)
        y_all[t] = h_new
        return h_new

    h_fin = jax.lax.fori_loop(0, seq_len, step, h0_ref[...], unroll=True)
    hfin_ref[...] = h_fin

    # --- 3) Decoder hoisted out of the time loop: one big lane-dense matmul.
    y2d = y_all[...].reshape(seq_len * Bp, Hp)  # tile-aligned merge of (T, B_pad)
    logits_ref[...] = (
        jnp.dot(y2d, wlin_ref[...], preferred_element_type=jnp.float32)
        + blin_ref[...])


def rnn_model_forward(inputs, state, params, vocab_size):
    """Forward pass matching RNNModel.forward.

    inputs : (B, T) int32
    state  : (1, B, H) float32
    returns (logits (T*B, V), new_state (1, B, H))
    """
    B, T = inputs.shape
    H = params["w_hh_t"].shape[0]
    V = vocab_size

    Bp = _round_up(B, 8)
    Hp = _round_up(H, 128)
    Vp = _round_up(V, 128)

    f32 = jnp.float32
    # Zero-pad parameters to lane/sublane-friendly shapes (exact numerics preserved).
    wih = jnp.zeros((V, 1, Hp), f32).at[:, 0, :H].set(params["w_ih_t"].astype(f32))
    whh = jnp.zeros((Hp, Hp), f32).at[:H, :H].set(params["w_hh_t"].astype(f32))
    brnn = jnp.zeros((Bp, Hp), f32).at[:, :H].set(
        jnp.broadcast_to(params["b_rnn"].astype(f32), (Bp, H)))
    wlin = jnp.zeros((Hp, Vp), f32).at[:H, :V].set(params["w_lin_t"].astype(f32))
    blin = jnp.zeros((1, Vp), f32).at[:, :V].set(params["b_lin"].astype(f32))
    h0 = jnp.zeros((Bp, Hp), f32).at[:B, :H].set(state[0].astype(f32))

    ids = inputs.T.reshape(-1).astype(jnp.int32)   # (T*B,), time-major like F.one_hot(inputs.T)

    grid_spec = pltpu.PrefetchScalarGridSpec(
        num_scalar_prefetch=1,          # token ids -> SMEM
        grid=(1,),                      # whole recurrence in one invocation
        in_specs=[
            pl.BlockSpec((V, 1, Hp), lambda i, ids: (0, 0, 0)),  # W_ih^T rows
            pl.BlockSpec((Hp, Hp), lambda i, ids: (0, 0)),       # W_hh^T
            pl.BlockSpec((Bp, Hp), lambda i, ids: (0, 0)),       # b_ih + b_hh (broadcast)
            pl.BlockSpec((Hp, Vp), lambda i, ids: (0, 0)),       # W_lin^T
            pl.BlockSpec((1, Vp), lambda i, ids: (0, 0)),        # b_lin
            pl.BlockSpec((Bp, Hp), lambda i, ids: (0, 0)),       # h0
        ],
        out_specs=[
            pl.BlockSpec((T * Bp, Vp), lambda i, ids: (0, 0)),   # logits (lane-dense)
            pl.BlockSpec((Bp, Hp), lambda i, ids: (0, 0)),       # final hidden state
        ],
        scratch_shapes=[
            pltpu.VMEM((T, Bp, Hp), f32),   # gathered inputs
            pltpu.VMEM((T, Bp, Hp), f32),   # hidden states for the decoder matmul
        ],
    )

    kernel = functools.partial(_rnn_fused_kernel, seq_len=T, batch=B)

    logits_pad, hfin_pad = pl.pallas_call(
        kernel,
        out_shape=(
            jax.ShapeDtypeStruct((T * Bp, Vp), f32),
            jax.ShapeDtypeStruct((Bp, Hp), f32),
        ),
        grid_spec=grid_spec,
        compiler_params=pltpu.CompilerParams(
            dimension_semantics=("arbitrary",)),
    )(ids, wih, whh, brnn, wlin, blin, h0)

    logits = logits_pad.reshape(T, Bp, Vp)[:, :B, :V].reshape(T * B, V)
    new_state = hfin_pad[:B, :H][None]
    return logits, new_state


def init_params(key, vocab_size, num_hiddens):
    """Deterministic init mimicking PyTorch's U(-1/sqrt(H), 1/sqrt(H))."""
    V, H = vocab_size, num_hiddens
    k = 1.0 / np.sqrt(H)
    keys = jax.random.split(key, 6)
    return {
        # stored pre-transposed so the kernel does x @ W / gather rows directly
        "w_ih_t": jax.random.uniform(keys[0], (V, H), jnp.float32, -k, k),
        "w_hh_t": jax.random.uniform(keys[1], (H, H), jnp.float32, -k, k),
        "b_rnn": (jax.random.uniform(keys[2], (1, H), jnp.float32, -k, k)
                  + jax.random.uniform(keys[3], (1, H), jnp.float32, -k, k)),
        "w_lin_t": jax.random.uniform(keys[4], (H, V), jnp.float32, -k, k),
        "b_lin": jax.random.uniform(keys[5], (1, V), jnp.float32, -k, k),
    }


def _reference_forward(inputs, state, params, vocab_size):
    """Pure-JAX reference of the same forward pass (for validation)."""
    x = jax.nn.one_hot(inputs.T, vocab_size, dtype=jnp.float32)  # (T, B, V)
    h = state[0]

    def step(h, x_t):
        h_new = jnp.tanh(x_t @ params["w_ih_t"] + h @ params["w_hh_t"]
                         + params["b_rnn"])
        return h_new, h_new

    h_fin, ys = jax.lax.scan(step, h, x)                          # ys: (T, B, H)
    T, B, H = ys.shape
    logits = ys.reshape(T * B, H) @ params["w_lin_t"] + params["b_lin"]
    return logits, h_fin[None]


if __name__ == "__main__":
    vocab_size = 32
    num_hiddens = 32
    batch_size = 2
    seq_len = 8

    key = jax.random.PRNGKey(0)
    pkey, ikey = jax.random.split(key)

    params = init_params(pkey, vocab_size, num_hiddens)
    inputs = jax.random.randint(ikey, (batch_size, seq_len), 0, vocab_size,
                                dtype=jnp.int32)
    # begin_state: zeros of shape (num_directions * num_layers, batch, hidden)
    state = jnp.zeros((1, batch_size, num_hiddens), jnp.float32)

    fwd = jax.jit(functools.partial(rnn_model_forward, vocab_size=vocab_size))
    logits, new_state = fwd(inputs, state, params)
    jax.block_until_ready((logits, new_state))

    ref_logits, ref_state = _reference_forward(inputs, state, params, vocab_size)
    np.testing.assert_allclose(np.asarray(logits), np.asarray(ref_logits),
                               rtol=1e-5, atol=1e-5)
    np.testing.assert_allclose(np.asarray(new_state), np.asarray(ref_state),
                               rtol=1e-5, atol=1e-5)

    assert logits.shape == (seq_len * batch_size, vocab_size)
    assert new_state.shape == (1, batch_size, num_hiddens)
    print("KERNEL_OK")
</pallas_src>

<mosaic_0001>
module attributes {stable_mosaic.version = 11 : i64} {
  func.func @_rnn_fused_kernel(%arg0: i32, %arg1: memref<16xi32, #tpu.memory_space<smem>>, %arg2: memref<32x1x128xf32, #tpu.memory_space<vmem>>, %arg3: memref<128x128xf32, #tpu.memory_space<vmem>>, %arg4: memref<8x128xf32, #tpu.memory_space<vmem>>, %arg5: memref<128x128xf32, #tpu.memory_space<vmem>>, %arg6: memref<1x128xf32, #tpu.memory_space<vmem>>, %arg7: memref<8x128xf32, #tpu.memory_space<vmem>>, %arg8: memref<64x128xf32, #tpu.memory_space<vmem>>, %arg9: memref<8x128xf32, #tpu.memory_space<vmem>>, %arg10: memref<8x8x128xf32, #tpu.memory_space<vmem>>, %arg11: memref<8x8x128xf32, #tpu.memory_space<vmem>>) attributes {dimension_semantics = [#tpu.dimension_semantics<arbitrary>], iteration_bounds = array<i64: 1>, scalar_prefetch = 1 : i64, scratch_operands = 2 : i64, tpu.core_type = #tpu.core_type<tc>, window_params = [{pipeline_mode = #tpu.pipeline_mode<synchronous>, transform_indices = @transform_0, window_bounds = array<i64: 32, 1, 128>}, {pipeline_mode = #tpu.pipeline_mode<synchronous>, transform_indices = @transform_1, window_bounds = array<i64: 128, 128>}, {pipeline_mode = #tpu.pipeline_mode<synchronous>, transform_indices = @transform_2, window_bounds = array<i64: 8, 128>}, {pipeline_mode = #tpu.pipeline_mode<synchronous>, transform_indices = @transform_3, window_bounds = array<i64: 128, 128>}, {pipeline_mode = #tpu.pipeline_mode<synchronous>, transform_indices = @transform_4, window_bounds = array<i64: 1, 128>}, {pipeline_mode = #tpu.pipeline_mode<synchronous>, transform_indices = @transform_5, window_bounds = array<i64: 8, 128>}, {pipeline_mode = #tpu.pipeline_mode<synchronous>, transform_indices = @transform_6, window_bounds = array<i64: 64, 128>}, {pipeline_mode = #tpu.pipeline_mode<synchronous>, transform_indices = @transform_7, window_bounds = array<i64: 8, 128>}]} {
    %cst = arith.constant 0.000000e+00 : f32
    %0 = vector.broadcast %cst : f32 to vector<8x8x128xf32>
    %c0 = arith.constant 0 : index
    %c0_0 = arith.constant 0 : index
    %c0_1 = arith.constant 0 : index
    %1 = vector.load %arg10[%c0, %c0_0, %c0_1] : memref<8x8x128xf32, #tpu.memory_space<vmem>>, vector<8x8x128xf32>
    tpu.vector_store %arg10[%c0, %c0_0, %c0_1], %0 {strides = array<i32>} : memref<8x8x128xf32, #tpu.memory_space<vmem>>, vector<8x8x128xf32>,
    %c0_2 = arith.constant 0 : index
    %2 = memref.load %arg1[%c0_2] : memref<16xi32, #tpu.memory_space<smem>>
    %3 = arith.index_cast %2 : i32 to index
    %c0_3 = arith.constant 0 : index
    %c0_4 = arith.constant 0 : index
    %4 = vector.load %arg2[%3, %c0_3, %c0_4] : memref<32x1x128xf32, #tpu.memory_space<vmem>>, vector<1x1x128xf32>
    %5 = vector.shape_cast %4 : vector<1x1x128xf32> to vector<1x128xf32>
    %c0_5 = arith.constant 0 : index
    %c0_6 = arith.constant 0 : index
    %c0_7 = arith.constant 0 : index
    %6 = vector.load %arg10[%c0_5, %c0_6, %c0_7] : memref<8x8x128xf32, #tpu.memory_space<vmem>>, vector<1x1x128xf32>
    %7 = vector.shape_cast %6 : vector<1x1x128xf32> to vector<1x128xf32>
    %8 = vector.shape_cast %5 : vector<1x128xf32> to vector<1x1x128xf32>
    tpu.vector_store %arg10[%c0_5, %c0_6, %c0_7], %8 {strides = array<i32>} : memref<8x8x128xf32, #tpu.memory_space<vmem>>, vector<1x1x128xf32>,
    %c1 = arith.constant 1 : index
    %9 = memref.load %arg1[%c1] : memref<16xi32, #tpu.memory_space<smem>>
    %10 = arith.index_cast %9 : i32 to index
    %c0_8 = arith.constant 0 : index
    %c0_9 = arith.constant 0 : index
    %11 = vector.load %arg2[%10, %c0_8, %c0_9] : memref<32x1x128xf32, #tpu.memory_space<vmem>>, vector<1x1x128xf32>
    %12 = vector.shape_cast %11 : vector<1x1x128xf32> to vector<1x128xf32>
    %c0_10 = arith.constant 0 : index
    %c1_11 = arith.constant 1 : index
    %c0_12 = arith.constant 0 : index
    %13 = vector.load %arg10[%c0_10, %c1_11, %c0_12] : memref<8x8x128xf32, #tpu.memory_space<vmem>>, vector<1x1x128xf32>
    %14 = vector.shape_cast %13 : vector<1x1x128xf32> to vector<1x128xf32>
    %15 = vector.shape_cast %12 : vector<1x128xf32> to vector<1x1x128xf32>
    tpu.vector_store %arg10[%c0_10, %c1_11, %c0_12], %15 {strides = array<i32>} : memref<8x8x128xf32, #tpu.memory_space<vmem>>, vector<1x1x128xf32>,
    %c2 = arith.constant 2 : index
    %16 = memref.load %arg1[%c2] : memref<16xi32, #tpu.memory_space<smem>>
    %17 = arith.index_cast %16 : i32 to index
    %c0_13 = arith.constant 0 : index
    %c0_14 = arith.constant 0 : index
    %18 = vector.load %arg2[%17, %c0_13, %c0_14] : memref<32x1x128xf32, #tpu.memory_space<vmem>>, vector<1x1x128xf32>
    %19 = vector.shape_cast %18 : vector<1x1x128xf32> to vector<1x128xf32>
    %c1_15 = arith.constant 1 : index
    %c0_16 = arith.constant 0 : index
    %c0_17 = arith.constant 0 : index
    %20 = vector.load %arg10[%c1_15, %c0_16, %c0_17] : memref<8x8x128xf32, #tpu.memory_space<vmem>>, vector<1x1x128xf32>
    %21 = vector.shape_cast %20 : vector<1x1x128xf32> to vector<1x128xf32>
    %22 = vector.shape_cast %19 : vector<1x128xf32> to vector<1x1x128xf32>
    tpu.vector_store %arg10[%c1_15, %c0_16, %c0_17], %22 {strides = array<i32>} : memref<8x8x128xf32, #tpu.memory_space<vmem>>, vector<1x1x128xf32>,
    %c3 = arith.constant 3 : index
    %23 = memref.load %arg1[%c3] : memref<16xi32, #tpu.memory_space<smem>>
    %24 = arith.index_cast %23 : i32 to index
    %c0_18 = arith.constant 0 : index
    %c0_19 = arith.constant 0 : index
    %25 = vector.load %arg2[%24, %c0_18, %c0_19] : memref<32x1x128xf32, #tpu.memory_space<vmem>>, vector<1x1x128xf32>
    %26 = vector.shape_cast %25 : vector<1x1x128xf32> to vector<1x128xf32>
    %c1_20 = arith.constant 1 : index
    %c1_21 = arith.constant 1 : index
    %c0_22 = arith.constant 0 : index
    %27 = vector.load %arg10[%c1_20, %c1_21, %c0_22] : memref<8x8x128xf32, #tpu.memory_space<vmem>>, vector<1x1x128xf32>
    %28 = vector.shape_cast %27 : vector<1x1x128xf32> to vector<1x128xf32>
    %29 = vector.shape_cast %26 : vector<1x128xf32> to vector<1x1x128xf32>
    tpu.vector_store %arg10[%c1_20, %c1_21, %c0_22], %29 {strides = array<i32>} : memref<8x8x128xf32, #tpu.memory_space<vmem>>, vector<1x1x128xf32>,
    %c4 = arith.constant 4 : index
    %30 = memref.load %arg1[%c4] : memref<16xi32, #tpu.memory_space<smem>>
    %31 = arith.index_cast %30 : i32 to index
    %c0_23 = arith.constant 0 : index
    %c0_24 = arith.constant 0 : index
    %32 = vector.load %arg2[%31, %c0_23, %c0_24] : memref<32x1x128xf32, #tpu.memory_space<vmem>>, vector<1x1x128xf32>
    %33 = vector.shape_cast %32 : vector<1x1x128xf32> to vector<1x128xf32>
    %c2_25 = arith.constant 2 : index
    %c0_26 = arith.constant 0 : index
    %c0_27 = arith.constant 0 : index
    %34 = vector.load %arg10[%c2_25, %c0_26, %c0_27] : memref<8x8x128xf32, #tpu.memory_space<vmem>>, vector<1x1x128xf32>
    %35 = vector.shape_cast %34 : vector<1x1x128xf32> to vector<1x128xf32>
    %36 = vector.shape_cast %33 : vector<1x128xf32> to vector<1x1x128xf32>
    tpu.vector_store %arg10[%c2_25, %c0_26, %c0_27], %36 {strides = array<i32>} : memref<8x8x128xf32, #tpu.memory_space<vmem>>, vector<1x1x128xf32>,
    %c5 = arith.constant 5 : index
    %37 = memref.load %arg1[%c5] : memref<16xi32, #tpu.memory_space<smem>>
    %38 = arith.index_cast %37 : i32 to index
    %c0_28 = arith.constant 0 : index
    %c0_29 = arith.constant 0 : index
    %39 = vector.load %arg2[%38, %c0_28, %c0_29] : memref<32x1x128xf32, #tpu.memory_space<vmem>>, vector<1x1x128xf32>
    %40 = vector.shape_cast %39 : vector<1x1x128xf32> to vector<1x128xf32>
    %c2_30 = arith.constant 2 : index
    %c1_31 = arith.constant 1 : index
    %c0_32 = arith.constant 0 : index
    %41 = vector.load %arg10[%c2_30, %c1_31, %c0_32] : memref<8x8x128xf32, #tpu.memory_space<vmem>>, vector<1x1x128xf32>
    %42 = vector.shape_cast %41 : vector<1x1x128xf32> to vector<1x128xf32>
    %43 = vector.shape_cast %40 : vector<1x128xf32> to vector<1x1x128xf32>
    tpu.vector_store %arg10[%c2_30, %c1_31, %c0_32], %43 {strides = array<i32>} : memref<8x8x128xf32, #tpu.memory_space<vmem>>, vector<1x1x128xf32>,
    %c6 = arith.constant 6 : index
    %44 = memref.load %arg1[%c6] : memref<16xi32, #tpu.memory_space<smem>>
    %45 = arith.index_cast %44 : i32 to index
    %c0_33 = arith.constant 0 : index
    %c0_34 = arith.constant 0 : index
    %46 = vector.load %arg2[%45, %c0_33, %c0_34] : memref<32x1x128xf32, #tpu.memory_space<vmem>>, vector<1x1x128xf32>
    %47 = vector.shape_cast %46 : vector<1x1x128xf32> to vector<1x128xf32>
    %c3_35 = arith.constant 3 : index
    %c0_36 = arith.constant 0 : index
    %c0_37 = arith.constant 0 : index
    %48 = vector.load %arg10[%c3_35, %c0_36, %c0_37] : memref<8x8x128xf32, #tpu.memory_space<vmem>>, vector<1x1x128xf32>
    %49 = vector.shape_cast %48 : vector<1x1x128xf32> to vector<1x128xf32>
    %50 = vector.shape_cast %47 : vector<1x128xf32> to vector<1x1x128xf32>
    tpu.vector_store %arg10[%c3_35, %c0_36, %c0_37], %50 {strides = array<i32>} : memref<8x8x128xf32, #tpu.memory_space<vmem>>, vector<1x1x128xf32>,
    %c7 = arith.constant 7 : index
    %51 = memref.load %arg1[%c7] : memref<16xi32, #tpu.memory_space<smem>>
    %52 = arith.index_cast %51 : i32 to index
    %c0_38 = arith.constant 0 : index
    %c0_39 = arith.constant 0 : index
    %53 = vector.load %arg2[%52, %c0_38, %c0_39] : memref<32x1x128xf32, #tpu.memory_space<vmem>>, vector<1x1x128xf32>
    %54 = vector.shape_cast %53 : vector<1x1x128xf32> to vector<1x128xf32>
    %c3_40 = arith.constant 3 : index
    %c1_41 = arith.constant 1 : index
    %c0_42 = arith.constant 0 : index
    %55 = vector.load %arg10[%c3_40, %c1_41, %c0_42] : memref<8x8x128xf32, #tpu.memory_space<vmem>>, vector<1x1x128xf32>
    %56 = vector.shape_cast %55 : vector<1x1x128xf32> to vector<1x128xf32>
    %57 = vector.shape_cast %54 : vector<1x128xf32> to vector<1x1x128xf32>
    tpu.vector_store %arg10[%c3_40, %c1_41, %c0_42], %57 {strides = array<i32>} : memref<8x8x128xf32, #tpu.memory_space<vmem>>, vector<1x1x128xf32>,
    %c8 = arith.constant 8 : index
    %58 = memref.load %arg1[%c8] : memref<16xi32, #tpu.memory_space<smem>>
    %59 = arith.index_cast %58 : i32 to index
    %c0_43 = arith.constant 0 : index
    %c0_44 = arith.constant 0 : index
    %60 = vector.load %arg2[%59, %c0_43, %c0_44] : memref<32x1x128xf32, #tpu.memory_space<vmem>>, vector<1x1x128xf32>
    %61 = vector.shape_cast %60 : vector<1x1x128xf32> to vector<1x128xf32>
    %c4_45 = arith.constant 4 : index
    %c0_46 = arith.constant 0 : index
    %c0_47 = arith.constant 0 : index
    %62 = vector.load %arg10[%c4_45, %c0_46, %c0_47] : memref<8x8x128xf32, #tpu.memory_space<vmem>>, vector<1x1x128xf32>
    %63 = vector.shape_cast %62 : vector<1x1x128xf32> to vector<1x128xf32>
    %64 = vector.shape_cast %61 : vector<1x128xf32> to vector<1x1x128xf32>
    tpu.vector_store %arg10[%c4_45, %c0_46, %c0_47], %64 {strides = array<i32>} : memref<8x8x128xf32, #tpu.memory_space<vmem>>, vector<1x1x128xf32>,
    %c9 = arith.constant 9 : index
    %65 = memref.load %arg1[%c9] : memref<16xi32, #tpu.memory_space<smem>>
    %66 = arith.index_cast %65 : i32 to index
    %c0_48 = arith.constant 0 : index
    %c0_49 = arith.constant 0 : index
    %67 = vector.load %arg2[%66, %c0_48, %c0_49] : memref<32x1x128xf32, #tpu.memory_space<vmem>>, vector<1x1x128xf32>
    %68 = vector.shape_cast %67 : vector<1x1x128xf32> to vector<1x128xf32>
    %c4_50 = arith.constant 4 : index
    %c1_51 = arith.constant 1 : index
    %c0_52 = arith.constant 0 : index
    %69 = vector.load %arg10[%c4_50, %c1_51, %c0_52] : memref<8x8x128xf32, #tpu.memory_space<vmem>>, vector<1x1x128xf32>
    %70 = vector.shape_cast %69 : vector<1x1x128xf32> to vector<1x128xf32>
    %71 = vector.shape_cast %68 : vector<1x128xf32> to vector<1x1x128xf32>
    tpu.vector_store %arg10[%c4_50, %c1_51, %c0_52], %71 {strides = array<i32>} : memref<8x8x128xf32, #tpu.memory_space<vmem>>, vector<1x1x128xf32>,
    %c10 = arith.constant 10 : index
    %72 = memref.load %arg1[%c10] : memref<16xi32, #tpu.memory_space<smem>>
    %73 = arith.index_cast %72 : i32 to index
    %c0_53 = arith.constant 0 : index
    %c0_54 = arith.constant 0 : index
    %74 = vector.load %arg2[%73, %c0_53, %c0_54] : memref<32x1x128xf32, #tpu.memory_space<vmem>>, vector<1x1x128xf32>
    %75 = vector.shape_cast %74 : vector<1x1x128xf32> to vector<1x128xf32>
    %c5_55 = arith.constant 5 : index
    %c0_56 = arith.constant 0 : index
    %c0_57 = arith.constant 0 : index
    %76 = vector.load %arg10[%c5_55, %c0_56, %c0_57] : memref<8x8x128xf32, #tpu.memory_space<vmem>>, vector<1x1x128xf32>
    %77 = vector.shape_cast %76 : vector<1x1x128xf32> to vector<1x128xf32>
    %78 = vector.shape_cast %75 : vector<1x128xf32> to vector<1x1x128xf32>
    tpu.vector_store %arg10[%c5_55, %c0_56, %c0_57], %78 {strides = array<i32>} : memref<8x8x128xf32, #tpu.memory_space<vmem>>, vector<1x1x128xf32>,
    %c11 = arith.constant 11 : index
    %79 = memref.load %arg1[%c11] : memref<16xi32, #tpu.memory_space<smem>>
    %80 = arith.index_cast %79 : i32 to index
    %c0_58 = arith.constant 0 : index
    %c0_59 = arith.constant 0 : index
    %81 = vector.load %arg2[%80, %c0_58, %c0_59] : memref<32x1x128xf32, #tpu.memory_space<vmem>>, vector<1x1x128xf32>
    %82 = vector.shape_cast %81 : vector<1x1x128xf32> to vector<1x128xf32>
    %c5_60 = arith.constant 5 : index
    %c1_61 = arith.constant 1 : index
    %c0_62 = arith.constant 0 : index
    %83 = vector.load %arg10[%c5_60, %c1_61, %c0_62] : memref<8x8x128xf32, #tpu.memory_space<vmem>>, vector<1x1x128xf32>
    %84 = vector.shape_cast %83 : vector<1x1x128xf32> to vector<1x128xf32>
    %85 = vector.shape_cast %82 : vector<1x128xf32> to vector<1x1x128xf32>
    tpu.vector_store %arg10[%c5_60, %c1_61, %c0_62], %85 {strides = array<i32>} : memref<8x8x128xf32, #tpu.memory_space<vmem>>, vector<1x1x128xf32>,
    %c12 = arith.constant 12 : index
    %86 = memref.load %arg1[%c12] : memref<16xi32, #tpu.memory_space<smem>>
    %87 = arith.index_cast %86 : i32 to index
    %c0_63 = arith.constant 0 : index
    %c0_64 = arith.constant 0 : index
    %88 = vector.load %arg2[%87, %c0_63, %c0_64] : memref<32x1x128xf32, #tpu.memory_space<vmem>>, vector<1x1x128xf32>
    %89 = vector.shape_cast %88 : vector<1x1x128xf32> to vector<1x128xf32>
    %c6_65 = arith.constant 6 : index
    %c0_66 = arith.constant 0 : index
    %c0_67 = arith.constant 0 : index
    %90 = vector.load %arg10[%c6_65, %c0_66, %c0_67] : memref<8x8x128xf32, #tpu.memory_space<vmem>>, vector<1x1x128xf32>
    %91 = vector.shape_cast %90 : vector<1x1x128xf32> to vector<1x128xf32>
    %92 = vector.shape_cast %89 : vector<1x128xf32> to vector<1x1x128xf32>
    tpu.vector_store %arg10[%c6_65, %c0_66, %c0_67], %92 {strides = array<i32>} : memref<8x8x128xf32, #tpu.memory_space<vmem>>, vector<1x1x128xf32>,
    %c13 = arith.constant 13 : index
    %93 = memref.load %arg1[%c13] : memref<16xi32, #tpu.memory_space<smem>>
    %94 = arith.index_cast %93 : i32 to index
    %c0_68 = arith.constant 0 : index
    %c0_69 = arith.constant 0 : index
    %95 = vector.load %arg2[%94, %c0_68, %c0_69] : memref<32x1x128xf32, #tpu.memory_space<vmem>>, vector<1x1x128xf32>
    %96 = vector.shape_cast %95 : vector<1x1x128xf32> to vector<1x128xf32>
    %c6_70 = arith.constant 6 : index
    %c1_71 = arith.constant 1 : index
    %c0_72 = arith.constant 0 : index
    %97 = vector.load %arg10[%c6_70, %c1_71, %c0_72] : memref<8x8x128xf32, #tpu.memory_space<vmem>>, vector<1x1x128xf32>
    %98 = vector.shape_cast %97 : vector<1x1x128xf32> to vector<1x128xf32>
    %99 = vector.shape_cast %96 : vector<1x128xf32> to vector<1x1x128xf32>
    tpu.vector_store %arg10[%c6_70, %c1_71, %c0_72], %99 {strides = array<i32>} : memref<8x8x128xf32, #tpu.memory_space<vmem>>, vector<1x1x128xf32>,
    %c14 = arith.constant 14 : index
    %100 = memref.load %arg1[%c14] : memref<16xi32, #tpu.memory_space<smem>>
    %101 = arith.index_cast %100 : i32 to index
    %c0_73 = arith.constant 0 : index
    %c0_74 = arith.constant 0 : index
    %102 = vector.load %arg2[%101, %c0_73, %c0_74] : memref<32x1x128xf32, #tpu.memory_space<vmem>>, vector<1x1x128xf32>
    %103 = vector.shape_cast %102 : vector<1x1x128xf32> to vector<1x128xf32>
    %c7_75 = arith.constant 7 : index
    %c0_76 = arith.constant 0 : index
    %c0_77 = arith.constant 0 : index
    %104 = vector.load %arg10[%c7_75, %c0_76, %c0_77] : memref<8x8x128xf32, #tpu.memory_space<vmem>>, vector<1x1x128xf32>
    %105 = vector.shape_cast %104 : vector<1x1x128xf32> to vector<1x128xf32>
    %106 = vector.shape_cast %103 : vector<1x128xf32> to vector<1x1x128xf32>
    tpu.vector_store %arg10[%c7_75, %c0_76, %c0_77], %106 {strides = array<i32>} : memref<8x8x128xf32, #tpu.memory_space<vmem>>, vector<1x1x128xf32>,
    %c15 = arith.constant 15 : index
    %107 = memref.load %arg1[%c15] : memref<16xi32, #tpu.memory_space<smem>>
    %108 = arith.index_cast %107 : i32 to index
    %c0_78 = arith.constant 0 : index
    %c0_79 = arith.constant 0 : index
    %109 = vector.load %arg2[%108, %c0_78, %c0_79] : memref<32x1x128xf32, #tpu.memory_space<vmem>>, vector<1x1x128xf32>
    %110 = vector.shape_cast %109 : vector<1x1x128xf32> to vector<1x128xf32>
    %c7_80 = arith.constant 7 : index
    %c1_81 = arith.constant 1 : index
    %c0_82 = arith.constant 0 : index
    %111 = vector.load %arg10[%c7_80, %c1_81, %c0_82] : memref<8x8x128xf32, #tpu.memory_space<vmem>>, vector<1x1x128xf32>
    %112 = vector.shape_cast %111 : vector<1x1x128xf32> to vector<1x128xf32>
    %113 = vector.shape_cast %110 : vector<1x128xf32> to vector<1x1x128xf32>
    tpu.vector_store %arg10[%c7_80, %c1_81, %c0_82], %113 {strides = array<i32>} : memref<8x8x128xf32, #tpu.memory_space<vmem>>, vector<1x1x128xf32>,
    %c0_83 = arith.constant 0 : index
    %c0_84 = arith.constant 0 : index
    %114 = vector.load %arg3[%c0_83, %c0_84] : memref<128x128xf32, #tpu.memory_space<vmem>>, vector<128x128xf32>
    %c0_85 = arith.constant 0 : index
    %c0_86 = arith.constant 0 : index
    %115 = vector.load %arg4[%c0_85, %c0_86] : memref<8x128xf32, #tpu.memory_space<vmem>>, vector<8x128xf32>
    %c0_87 = arith.constant 0 : index
    %c0_88 = arith.constant 0 : index
    %116 = vector.load %arg7[%c0_87, %c0_88] : memref<8x128xf32, #tpu.memory_space<vmem>>, vector<8x128xf32>
    %c0_i32 = arith.constant 0 : i32
    %117 = arith.index_cast %c0_i32 : i32 to index
    %c0_89 = arith.constant 0 : index
    %c0_90 = arith.constant 0 : index
    %118 = vector.load %arg10[%117, %c0_89, %c0_90] : memref<8x8x128xf32, #tpu.memory_space<vmem>>, vector<1x8x128xf32>
    %119 = vector.shape_cast %118 : vector<1x8x128xf32> to vector<8x128xf32>
    %cst_91 = arith.constant dense<0.000000e+00> : vector<8x128xf32>
    %120 = tpu.matmul %116, %114, %cst_91 {dimension_numbers = #tpu.dot_dimension_numbers<[1], [0], [0], [1], [0, 0, 1, 1], [], []>} : vector<8x128xf32>, vector<128x128xf32>, vector<8x128xf32> -> vector<8x128xf32>
    %121 = arith.addf %119, %120 : vector<8x128xf32>
    %122 = arith.addf %121, %115 : vector<8x128xf32>
    %123 = math.tanh %122 : vector<8x128xf32>
    %124 = arith.index_cast %c0_i32 : i32 to index
    %c0_92 = arith.constant 0 : index
    %c0_93 = arith.constant 0 : index
    %125 = vector.load %arg11[%124, %c0_92, %c0_93] : memref<8x8x128xf32, #tpu.memory_space<vmem>>, vector<1x8x128xf32>
    %126 = vector.shape_cast %125 : vector<1x8x128xf32> to vector<8x128xf32>
    %127 = vector.shape_cast %123 : vector<8x128xf32> to vector<1x8x128xf32>
    tpu.vector_store %arg11[%124, %c0_92, %c0_93], %127 {strides = array<i32>} : memref<8x8x128xf32, #tpu.memory_space<vmem>>, vector<1x8x128xf32>,
    %c1_i32 = arith.constant 1 : i32
    %128 = arith.index_cast %c1_i32 : i32 to index
    %c0_94 = arith.constant 0 : index
    %c0_95 = arith.constant 0 : index
    %129 = vector.load %arg10[%128, %c0_94, %c0_95] : memref<8x8x128xf32, #tpu.memory_space<vmem>>, vector<1x8x128xf32>
    %130 = vector.shape_cast %129 : vector<1x8x128xf32> to vector<8x128xf32>
    %cst_96 = arith.constant dense<0.000000e+00> : vector<8x128xf32>
    %131 = tpu.matmul %123, %114, %cst_96 {dimension_numbers = #tpu.dot_dimension_numbers<[1], [0], [0], [1], [0, 0, 1, 1], [], []>} : vector<8x128xf32>, vector<128x128xf32>, vector<8x128xf32> -> vector<8x128xf32>
    %132 = arith.addf %130, %131 : vector<8x128xf32>
    %133 = arith.addf %132, %115 : vector<8x128xf32>
    %134 = math.tanh %133 : vector<8x128xf32>
    %135 = arith.index_cast %c1_i32 : i32 to index
    %c0_97 = arith.constant 0 : index
    %c0_98 = arith.constant 0 : index
    %136 = vector.load %arg11[%135, %c0_97, %c0_98] : memref<8x8x128xf32, #tpu.memory_space<vmem>>, vector<1x8x128xf32>
    %137 = vector.shape_cast %136 : vector<1x8x128xf32> to vector<8x128xf32>
    %138 = vector.shape_cast %134 : vector<8x128xf32> to vector<1x8x128xf32>
    tpu.vector_store %arg11[%135, %c0_97, %c0_98], %138 {strides = array<i32>} : memref<8x8x128xf32, #tpu.memory_space<vmem>>, vector<1x8x128xf32>,
    %c2_i32 = arith.constant 2 : i32
    %139 = arith.index_cast %c2_i32 : i32 to index
    %c0_99 = arith.constant 0 : index
    %c0_100 = arith.constant 0 : index
    %140 = vector.load %arg10[%139, %c0_99, %c0_100] : memref<8x8x128xf32, #tpu.memory_space<vmem>>, vector<1x8x128xf32>
    %141 = vector.shape_cast %140 : vector<1x8x128xf32> to vector<8x128xf32>
    %cst_101 = arith.constant dense<0.000000e+00> : vector<8x128xf32>
    %142 = tpu.matmul %134, %114, %cst_101 {dimension_numbers = #tpu.dot_dimension_numbers<[1], [0], [0], [1], [0, 0, 1, 1], [], []>} : vector<8x128xf32>, vector<128x128xf32>, vector<8x128xf32> -> vector<8x128xf32>
    %143 = arith.addf %141, %142 : vector<8x128xf32>
    %144 = arith.addf %143, %115 : vector<8x128xf32>
    %145 = math.tanh %144 : vector<8x128xf32>
    %146 = arith.index_cast %c2_i32 : i32 to index
    %c0_102 = arith.constant 0 : index
    %c0_103 = arith.constant 0 : index
    %147 = vector.load %arg11[%146, %c0_102, %c0_103] : memref<8x8x128xf32, #tpu.memory_space<vmem>>, vector<1x8x128xf32>
    %148 = vector.shape_cast %147 : vector<1x8x128xf32> to vector<8x128xf32>
    %149 = vector.shape_cast %145 : vector<8x128xf32> to vector<1x8x128xf32>
    tpu.vector_store %arg11[%146, %c0_102, %c0_103], %149 {strides = array<i32>} : memref<8x8x128xf32, #tpu.memory_space<vmem>>, vector<1x8x128xf32>,
    %c3_i32 = arith.constant 3 : i32
    %150 = arith.index_cast %c3_i32 : i32 to index
    %c0_104 = arith.constant 0 : index
    %c0_105 = arith.constant 0 : index
    %151 = vector.load %arg10[%150, %c0_104, %c0_105] : memref<8x8x128xf32, #tpu.memory_space<vmem>>, vector<1x8x128xf32>
    %152 = vector.shape_cast %151 : vector<1x8x128xf32> to vector<8x128xf32>
    %cst_106 = arith.constant dense<0.000000e+00> : vector<8x128xf32>
    %153 = tpu.matmul %145, %114, %cst_106 {dimension_numbers = #tpu.dot_dimension_numbers<[1], [0], [0], [1], [0, 0, 1, 1], [], []>} : vector<8x128xf32>, vector<128x128xf32>, vector<8x128xf32> -> vector<8x128xf32>
    %154 = arith.addf %152, %153 : vector<8x128xf32>
    %155 = arith.addf %154, %115 : vector<8x128xf32>
    %156 = math.tanh %155 : vector<8x128xf32>
    %157 = arith.index_cast %c3_i32 : i32 to index
    %c0_107 = arith.constant 0 : index
    %c0_108 = arith.constant 0 : index
    %158 = vector.load %arg11[%157, %c0_107, %c0_108] : memref<8x8x128xf32, #tpu.memory_space<vmem>>, vector<1x8x128xf32>
    %159 = vector.shape_cast %158 : vector<1x8x128xf32> to vector<8x128xf32>
    %160 = vector.shape_cast %156 : vector<8x128xf32> to vector<1x8x128xf32>
    tpu.vector_store %arg11[%157, %c0_107, %c0_108], %160 {strides = array<i32>} : memref<8x8x128xf32, #tpu.memory_space<vmem>>, vector<1x8x128xf32>,
    %c4_i32 = arith.constant 4 : i32
    %161 = arith.index_cast %c4_i32 : i32 to index
    %c0_109 = arith.constant 0 : index
    %c0_110 = arith.constant 0 : index
    %162 = vector.load %arg10[%161, %c0_109, %c0_110] : memref<8x8x128xf32, #tpu.memory_space<vmem>>, vector<1x8x128xf32>
    %163 = vector.shape_cast %162 : vector<1x8x128xf32> to vector<8x128xf32>
    %cst_111 = arith.constant dense<0.000000e+00> : vector<8x128xf32>
    %164 = tpu.matmul %156, %114, %cst_111 {dimension_numbers = #tpu.dot_dimension_numbers<[1], [0], [0], [1], [0, 0, 1, 1], [], []>} : vector<8x128xf32>, vector<128x128xf32>, vector<8x128xf32> -> vector<8x128xf32>
    %165 = arith.addf %163, %164 : vector<8x128xf32>
    %166 = arith.addf %165, %115 : vector<8x128xf32>
    %167 = math.tanh %166 : vector<8x128xf32>
    %168 = arith.index_cast %c4_i32 : i32 to index
    %c0_112 = arith.constant 0 : index
    %c0_113 = arith.constant 0 : index
    %169 = vector.load %arg11[%168, %c0_112, %c0_113] : memref<8x8x128xf32, #tpu.memory_space<vmem>>, vector<1x8x128xf32>
    %170 = vector.shape_cast %169 : vector<1x8x128xf32> to vector<8x128xf32>
    %171 = vector.shape_cast %167 : vector<8x128xf32> to vector<1x8x128xf32>
    tpu.vector_store %arg11[%168, %c0_112, %c0_113], %171 {strides = array<i32>} : memref<8x8x128xf32, #tpu.memory_space<vmem>>, vector<1x8x128xf32>,
    %c5_i32 = arith.constant 5 : i32
    %172 = arith.index_cast %c5_i32 : i32 to index
    %c0_114 = arith.constant 0 : index
    %c0_115 = arith.constant 0 : index
    %173 = vector.load %arg10[%172, %c0_114, %c0_115] : memref<8x8x128xf32, #tpu.memory_space<vmem>>, vector<1x8x128xf32>
    %174 = vector.shape_cast %173 : vector<1x8x128xf32> to vector<8x128xf32>
    %cst_116 = arith.constant dense<0.000000e+00> : vector<8x128xf32>
    %175 = tpu.matmul %167, %114, %cst_116 {dimension_numbers = #tpu.dot_dimension_numbers<[1], [0], [0], [1], [0, 0, 1, 1], [], []>} : vector<8x128xf32>, vector<128x128xf32>, vector<8x128xf32> -> vector<8x128xf32>
    %176 = arith.addf %174, %175 : vector<8x128xf32>
    %177 = arith.addf %176, %115 : vector<8x128xf32>
    %178 = math.tanh %177 : vector<8x128xf32>
    %179 = arith.index_cast %c5_i32 : i32 to index
    %c0_117 = arith.constant 0 : index
    %c0_118 = arith.constant 0 : index
    %180 = vector.load %arg11[%179, %c0_117, %c0_118] : memref<8x8x128xf32, #tpu.memory_space<vmem>>, vector<1x8x128xf32>
    %181 = vector.shape_cast %180 : vector<1x8x128xf32> to vector<8x128xf32>
    %182 = vector.shape_cast %178 : vector<8x128xf32> to vector<1x8x128xf32>
    tpu.vector_store %arg11[%179, %c0_117, %c0_118], %182 {strides = array<i32>} : memref<8x8x128xf32, #tpu.memory_space<vmem>>, vector<1x8x128xf32>,
    %c6_i32 = arith.constant 6 : i32
    %183 = arith.index_cast %c6_i32 : i32 to index
    %c0_119 = arith.constant 0 : index
    %c0_120 = arith.constant 0 : index
    %184 = vector.load %arg10[%183, %c0_119, %c0_120] : memref<8x8x128xf32, #tpu.memory_space<vmem>>, vector<1x8x128xf32>
    %185 = vector.shape_cast %184 : vector<1x8x128xf32> to vector<8x128xf32>
    %cst_121 = arith.constant dense<0.000000e+00> : vector<8x128xf32>
    %186 = tpu.matmul %178, %114, %cst_121 {dimension_numbers = #tpu.dot_dimension_numbers<[1], [0], [0], [1], [0, 0, 1, 1], [], []>} : vector<8x128xf32>, vector<128x128xf32>, vector<8x128xf32> -> vector<8x128xf32>
    %187 = arith.addf %185, %186 : vector<8x128xf32>
    %188 = arith.addf %187, %115 : vector<8x128xf32>
    %189 = math.tanh %188 : vector<8x128xf32>
    %190 = arith.index_cast %c6_i32 : i32 to index
    %c0_122 = arith.constant 0 : index
    %c0_123 = arith.constant 0 : index
    %191 = vector.load %arg11[%190, %c0_122, %c0_123] : memref<8x8x128xf32, #tpu.memory_space<vmem>>, vector<1x8x128xf32>
    %192 = vector.shape_cast %191 : vector<1x8x128xf32> to vector<8x128xf32>
    %193 = vector.shape_cast %189 : vector<8x128xf32> to vector<1x8x128xf32>
    tpu.vector_store %arg11[%190, %c0_122, %c0_123], %193 {strides = array<i32>} : memref<8x8x128xf32, #tpu.memory_space<vmem>>, vector<1x8x128xf32>,
    %c7_i32 = arith.constant 7 : i32
    %194 = arith.index_cast %c7_i32 : i32 to index
    %c0_124 = arith.constant 0 : index
    %c0_125 = arith.constant 0 : index
    %195 = vector.load %arg10[%194, %c0_124, %c0_125] : memref<8x8x128xf32, #tpu.memory_space<vmem>>, vector<1x8x128xf32>
    %196 = vector.shape_cast %195 : vector<1x8x128xf32> to vector<8x128xf32>
    %cst_126 = arith.constant dense<0.000000e+00> : vector<8x128xf32>
    %197 = tpu.matmul %189, %114, %cst_126 {dimension_numbers = #tpu.dot_dimension_numbers<[1], [0], [0], [1], [0, 0, 1, 1], [], []>} : vector<8x128xf32>, vector<128x128xf32>, vector<8x128xf32> -> vector<8x128xf32>
    %198 = arith.addf %196, %197 : vector<8x128xf32>
    %199 = arith.addf %198, %115 : vector<8x128xf32>
    %200 = math.tanh %199 : vector<8x128xf32>
    %201 = arith.index_cast %c7_i32 : i32 to index
    %c0_127 = arith.constant 0 : index
    %c0_128 = arith.constant 0 : index
    %202 = vector.load %arg11[%201, %c0_127, %c0_128] : memref<8x8x128xf32, #tpu.memory_space<vmem>>, vector<1x8x128xf32>
    %203 = vector.shape_cast %202 : vector<1x8x128xf32> to vector<8x128xf32>
    %204 = vector.shape_cast %200 : vector<8x128xf32> to vector<1x8x128xf32>
    tpu.vector_store %arg11[%201, %c0_127, %c0_128], %204 {strides = array<i32>} : memref<8x8x128xf32, #tpu.memory_space<vmem>>, vector<1x8x128xf32>,
    %c8_i32 = arith.constant 8 : i32
    %c0_129 = arith.constant 0 : index
    %c0_130 = arith.constant 0 : index
    %205 = vector.load %arg9[%c0_129, %c0_130] : memref<8x128xf32, #tpu.memory_space<vmem>>, vector<8x128xf32>
    tpu.vector_store %arg9[%c0_129, %c0_130], %200 {strides = array<i32>} : memref<8x128xf32, #tpu.memory_space<vmem>>, vector<8x128xf32>,
    %c0_131 = arith.constant 0 : index
    %c0_132 = arith.constant 0 : index
    %c0_133 = arith.constant 0 : index
    %206 = vector.load %arg11[%c0_131, %c0_132, %c0_133] : memref<8x8x128xf32, #tpu.memory_space<vmem>>, vector<8x8x128xf32>
    %207 = vector.shape_cast %206 : vector<8x8x128xf32> to vector<64x128xf32>
    %c0_134 = arith.constant 0 : index
    %c0_135 = arith.constant 0 : index
    %208 = vector.load %arg5[%c0_134, %c0_135] : memref<128x128xf32, #tpu.memory_space<vmem>>, vector<128x128xf32>
    %cst_136 = arith.constant dense<0.000000e+00> : vector<64x128xf32>
    %209 = tpu.matmul %207, %208, %cst_136 {dimension_numbers = #tpu.dot_dimension_numbers<[1], [0], [0], [1], [0, 0, 1, 1], [], []>} : vector<64x128xf32>, vector<128x128xf32>, vector<64x128xf32> -> vector<64x128xf32>
    %c0_137 = arith.constant 0 : index
    %c0_138 = arith.constant 0 : index
    %210 = vector.load %arg6[%c0_137, %c0_138] : memref<1x128xf32, #tpu.memory_space<vmem>>, vector<1x128xf32>
    %211 = vector.broadcast %210 : vector<1x128xf32> to vector<64x128xf32>
    %212 = arith.addf %209, %211 : vector<64x128xf32>
    %c0_139 = arith.constant 0 : index
    %c0_140 = arith.constant 0 : index
    %213 = vector.load %arg8[%c0_139, %c0_140] : memref<64x128xf32, #tpu.memory_space<vmem>>, vector<64x128xf32>
    tpu.vector_store %arg8[%c0_139, %c0_140], %212 {strides = array<i32>} : memref<64x128xf32, #tpu.memory_space<vmem>>, vector<64x128xf32>,
    return
  }
  func.func @transform_0(%arg0: i32, %arg1: memref<16xi32, #tpu.memory_space<smem>>) -> (i32, i32, i32) {
    %c0_i32 = arith.constant 0 : i32
    %c0_i32_0 = arith.constant 0 : i32
    %c0_i32_1 = arith.constant 0 : i32
    %c0_i32_2 = arith.constant 0 : i32
    return %c0_i32, %c0_i32_0, %c0_i32_1 : i32, i32, i32
  }
  func.func @transform_1(%arg0: i32, %arg1: memref<16xi32, #tpu.memory_space<smem>>) -> (i32, i32) {
    %c0_i32 = arith.constant 0 : i32
    %c0_i32_0 = arith.constant 0 : i32
    %c0_i32_1 = arith.constant 0 : i32
    return %c0_i32, %c0_i32_0 : i32, i32
  }
  func.func @transform_2(%arg0: i32, %arg1: memref<16xi32, #tpu.memory_space<smem>>) -> (i32, i32) {
    %c0_i32 = arith.constant 0 : i32
    %c0_i32_0 = arith.constant 0 : i32
    %c0_i32_1 = arith.constant 0 : i32
    return %c0_i32, %c0_i32_0 : i32, i32
  }
  func.func @transform_3(%arg0: i32, %arg1: memref<16xi32, #tpu.memory_space<smem>>) -> (i32, i32) {
    %c0_i32 = arith.constant 0 : i32
    %c0_i32_0 = arith.constant 0 : i32
    %c0_i32_1 = arith.constant 0 : i32
    return %c0_i32, %c0_i32_0 : i32, i32
  }
  func.func @transform_4(%arg0: i32, %arg1: memref<16xi32, #tpu.memory_space<smem>>) -> (i32, i32) {
    %c0_i32 = arith.constant 0 : i32
    %c0_i32_0 = arith.constant 0 : i32
    %c0_i32_1 = arith.constant 0 : i32
    return %c0_i32, %c0_i32_0 : i32, i32
  }
  func.func @transform_5(%arg0: i32, %arg1: memref<16xi32, #tpu.memory_space<smem>>) -> (i32, i32) {
    %c0_i32 = arith.constant 0 : i32
    %c0_i32_0 = arith.constant 0 : i32
    %c0_i32_1 = arith.constant 0 : i32
    return %c0_i32, %c0_i32_0 : i32, i32
  }
  func.func @transform_6(%arg0: i32, %arg1: memref<16xi32, #tpu.memory_space<smem>>) -> (i32, i32) {
    %c0_i32 = arith.constant 0 : i32
    %c0_i32_0 = arith.constant 0 : i32
    %c0_i32_1 = arith.constant 0 : i32
    return %c0_i32, %c0_i32_0 : i32, i32
  }
  func.func @transform_7(%arg0: i32, %arg1: memref<16xi32, #tpu.memory_space<smem>>) -> (i32, i32) {
    %c0_i32 = arith.constant 0 : i32
    %c0_i32_0 = arith.constant 0 : i32
    %c0_i32_1 = arith.constant 0 : i32
    return %c0_i32, %c0_i32_0 : i32, i32
  }
}

</mosaic_0001>

<bundles_post_ra>
// kernel: rnn_model_forward.1
= control target key start
LH: loop header
LB: loop body
LE: loop exit
PB: predicated region body
PF: predicated region fallthrough
CT: control target
= control target key end

     0   :  { %s2011_s0 = inlined_call_operand.vmem [shape: s32[16], index: 0, kind: input, shape index: {}]   ;;  %s2012_s1 = inlined_call_operand.vmem [shape: f32[32,1,128], index: 1, kind: input, shape index: {}]   ;;  %s2013_s2 = inlined_call_operand.vmem [shape: f32[128,128], index: 2, kind: input, shape index: {}]   ;;  %s2014_s3 = inlined_call_operand.vmem [shape: f32[8,128], index: 3, kind: input, shape index: {}]   ;;  %s2015_s4 = inlined_call_operand.vmem [shape: f32[128,128], index: 4, kind: input, shape index: {}]   ;;  %s2016_s5 = inlined_call_operand.vmem [shape: f32[1,128], index: 5, kind: input, shape index: {}]   ;;  %s2017_s6 = inlined_call_operand.vmem [shape: f32[8,128], index: 6, kind: input, shape index: {}]   ;;  %s2018_s7 = inlined_call_operand.vmem [shape: f32[64,128], index: 7, kind: output, shape index: {0}]   ;;  %s2019_s8 = inlined_call_operand.vmem [shape: f32[8,128], index: 8, kind: output, shape index: {1}]  }
   0x1   :  { %s14_s29 = sshll.u32 %s2011_s0, 4  ;;  %s15_s29 = int_to_ptr.vmem [resolvable:$true] %s14_s29 }
   0x2   :  { %s1424_s30 = scalar_lea.vmem %s15_s29, 16  ;;  %p1429_p1 = scmp.lt.s32.totalorder %s15_s29, %s15_s29 }
   0x3   :  { %p1425_p0 = scmp.ne.s32.totalorder %s15_s29, %s1424_s30  ;;  %p1430_p2 = scmp.lt.s32.totalorder %s1424_s30, %s1424_s30 }
   0x5   :  { %p1431_p3 = por %p1430_p2, %p1429_p1 }
   0x7   :  { %p1432_p4 = pnand %p1431_p3, %p1425_p0 }
   0x9   :  { %1435 = shalt.err (!%p1432_p4)  }
   0xa   :  { %s1438_s9 = smov [#allocation5]  }
   0xb   :  { %17 = dma.vmem_to_smem %s15_s29, 16, %s1438_s9, [#allocation4] }
   0xc   :  { %1436 = dma.done.wait [#allocation4], 16 }
   0xd   :  { %1437 = vsyncadd [#allocation4], 4294967280 }
   0xe   :  { %19 = sfence }
   0xf   :  { %v1492_v0 = vld [vmem:[%s2013_s2 + $0x78] sm:$0xff]  ;;  %v1439_v1 = vmov 0.0   ;;  %v1506_v2 = vld [vmem:[%s2013_s2 + $0x70] sm:$0xff]  ;;  %vm1440_vm0 = vmmov 0   ;;  %s40_s13 = sld [smem:[#allocation5]]  ;;  %v1516_v3 = vld [vmem:[%s2013_s2 + $0x68] sm:$0xff] }
  0x10   :  { %1081 = vmatprep.subr.mxu1 %v1439_v1  ;;  %32 = vst [vmem:[#allocation2] sm:$0xff] %v1439_v1  ;;  %33 = vst [vmem:[#allocation2 + $0x8] sm:$0xff] %v1439_v1  ;;  %1113 = vmatprep.mubr.msk.f32.mxu1 %vm1440_vm0, %v1439_v1  ;;  %s905_s14 = sld [smem:[#allocation5 + $0x1]]  ;;  %v1525_v4 = vld [vmem:[%s2013_s2 + $0x60] sm:$0xff]  ;;  %v1534_v5 = vld [vmem:[%s2013_s2 + $0x58] sm:$0xff] }
  0x11   :  { %34 = vst [vmem:[#allocation2 + $0x10] sm:$0xff] %v1439_v1  ;;  %35 = vst [vmem:[#allocation2 + $0x18] sm:$0xff] %v1439_v1  ;;  %1082 = vmatpush3.msra.mxu1 %v1492_v0  ;;  %1151 = vmatprep.subr.mxu0 %v1439_v1  ;;  %v1549_v7 = vld [vmem:[%s2013_s2 + $0x50] sm:$0xff]  ;;  %v1558_v9 = vld [vmem:[%s2013_s2 + $0x48] sm:$0xff]  ;;  %s910_s20 = sld [smem:[#allocation5 + $0x6]] }
  0x12   :  { %36 = vst [vmem:[#allocation2 + $0x20] sm:$0xff] %v1439_v1  ;;  %37 = vst [vmem:[#allocation2 + $0x28] sm:$0xff] %v1439_v1  ;;  %1083 = vmatprep.subr.mxu1 %v1439_v1  ;;  %1152 = vmatpush3.msra.mxu0 %v1492_v0  ;;  %v1567_v10 = vld [vmem:[%s2013_s2 + $0x40] sm:$0xff]  ;;  %v1576_v11 = vld [vmem:[%s2013_s2 + $0x38] sm:$0xff]  ;;  %s911_s21 = sld [smem:[#allocation5 + $0x7]] }
  0x13   :  { %38 = vst [vmem:[#allocation2 + $0x30] sm:$0xff] %v1439_v1  ;;  %39 = vst [vmem:[#allocation2 + $0x38] sm:$0xff] %v1439_v1  ;;  %1084 = vmatpush3.msra.mxu1 %v1506_v2  ;;  %1153 = vmatprep.subr.mxu0 %v1439_v1  ;;  %v1585_v12 = vld [vmem:[%s2013_s2 + $0x30] sm:$0xff]  ;;  %v1594_v13 = vld [vmem:[%s2013_s2 + $0x28] sm:$0xff]  ;;  %s914_s0 = sld [smem:[#allocation5 + $0xa]] }
  0x14   :  { %1085 = vmatprep.subr.mxu1 %v1439_v1  ;;  %1154 = vmatpush3.msra.mxu0 %v1506_v2  ;;  %v1603_v14 = vld [vmem:[%s2013_s2 + $0x20] sm:$0xff]  ;;  %v1612_v15 = vld [vmem:[%s2013_s2 + $0x18] sm:$0xff]  ;;  %v1621_v16 = vld [vmem:[%s2013_s2 + $0x10] sm:$0xff]  ;;  %s915_s12 = sld [smem:[#allocation5 + $0xb]] }
  0x15   :  { %1086 = vmatpush3.msra.mxu1 %v1516_v3  ;;  %1155 = vmatprep.subr.mxu0 %v1439_v1  ;;  %s41_s23 = scalar_lea.vmem %s2012_s1, %s40_s13  ;;  %v1630_v17 = vld [vmem:[%s2013_s2 + $0x8] sm:$0xff]  ;;  %v1639_v18 = vld [vmem:[%s2013_s2] sm:$0xff]  ;;  %s906_s2 = sld [smem:[#allocation5 + $0x2]]  ;;  %v760_v61 = vld [vmem:[%s2015_s4 + $0x78] sm:$0xff] }
  0x16   :  { %1087 = vmatprep.subr.mxu1 %v1439_v1  ;;  %1156 = vmatpush3.msra.mxu0 %v1516_v3  ;;  %v42_v6 = vld [vmem:[%s41_s23] sm:$0x1]  ;;  %s45_s26 = scalar_lea.vmem %s2012_s1, %s905_s14  ;;  %s909_s13 = sld [smem:[#allocation5 + $0x5]] }
  0x17   :  { %1088 = vmatpush3.msra.mxu1 %v1525_v4  ;;  %1157 = vmatprep.subr.mxu0 %v1439_v1  ;;  %43 = vst [vmem:[#allocation2] sm:$0x1] %v42_v6  ;;  %v46_v8 = vld [vmem:[%s45_s26] sm:$0x1]  ;;  %s67_s24 = scalar_lea.vmem %s2012_s1, %s910_s20  ;;  %s916_s20 = sld [smem:[#allocation5 + $0xc]]  ;;  %v759_v6 = vld [vmem:[%s2015_s4 + $0x70] sm:$0xff] }
  0x18   :  { %1089 = vmatprep.subr.mxu1 %v1439_v1  ;;  %1158 = vmatpush3.msra.mxu0 %v1525_v4  ;;  %47 = vst [vmem:[#allocation2 + $0x1] sm:$0x1] %v46_v8  ;;  %v128_v19 = vld [vmem:[%s2017_s6] sm:$0xff]  ;;  %s907_s6 = sld [smem:[#allocation5 + $0x3]]  ;;  %s72_s27 = scalar_lea.vmem %s2012_s1, %s911_s21 }
  0x19   :  { %1090 = vmatpush3.msra.mxu1 %v1534_v5  ;;  %1159 = vmatprep.subr.mxu0 %v1439_v1  ;;  %v1699_v23 = vld [vmem:[%s2014_s3] sm:$0xff]  ;;  %s908_s3 = sld [smem:[#allocation5 + $0x4]]  ;;  %s85_s14 = scalar_lea.vmem %s2012_s1, %s914_s0 }
  0x1a   :  { %1091 = vmatprep.subr.mxu1 %v1439_v1  ;;  %1160 = vmatpush3.msra.mxu0 %v1534_v5  ;;  %v68_v37 = vld [vmem:[%s67_s24] sm:$0x1]  ;;  %s90_s17 = scalar_lea.vmem %s2012_s1, %s915_s12  ;;  %s917_s21 = sld [smem:[#allocation5 + $0xd]] }
  0x1b   :  { %1092 = vmatpush3.msra.mxu1 %v1549_v7  ;;  %1161 = vmatprep.subr.mxu0 %v1439_v1  ;;  %s49_s30 = scalar_lea.vmem %s2012_s1, %s906_s2  ;;  %70 = vst [vmem:[#allocation2 + $0x18] sm:$0x1] %v68_v37  ;;  %v73_v38 = vld [vmem:[%s72_s27] sm:$0x1]  ;;  %s912_s2 = sld [smem:[#allocation5 + $0x8]] }
  0x1c   :  { %1093 = vmatprep.subr.mxu1 %v1439_v1  ;;  %1162 = vmatpush3.msra.mxu0 %v1549_v7  ;;  %v50_v20 = vld [vmem:[%s49_s30] sm:$0x1]  ;;  %s63_s19 = scalar_lea.vmem %s2012_s1, %s909_s13  ;;  %74 = vst [vmem:[#allocation2 + $0x19] sm:$0x1] %v73_v38  ;;  %s919_s9 = sld [smem:[#allocation5 + $0xf]] }
  0x1d   :  { %1094 = vmatpush3.msra.mxu1 %v1558_v9  ;;  %1163 = vmatprep.subr.mxu0 %v1439_v1  ;;  %52 = vst [vmem:[#allocation2 + $0x8] sm:$0x1] %v50_v20  ;;  %v64_v30 = vld [vmem:[%s63_s19] sm:$0x1]  ;;  %s94_s24 = scalar_lea.vmem %s2012_s1, %s916_s20 }
  0x1e   :  { %1095 = vmatprep.subr.mxu1 %v1439_v1  ;;  %1164 = vmatpush3.msra.mxu0 %v1558_v9  ;;  %s54_s11 = scalar_lea.vmem %s2012_s1, %s907_s6  ;;  %65 = vst [vmem:[#allocation2 + $0x11] sm:$0x1] %v64_v30  ;;  %s913_s6 = sld [smem:[#allocation5 + $0x9]]  ;;  %v86_v53 = vld [vmem:[%s85_s14] sm:$0x1] }
  0x1f   :  { %1096 = vmatpush3.msra.mxu1 %v1567_v10  ;;  %1165 = vmatprep.subr.mxu0 %v1439_v1  ;;  %v55_v21 = vld [vmem:[%s54_s11] sm:$0x1]  ;;  %s58_s16 = scalar_lea.vmem %s2012_s1, %s908_s3  ;;  %88 = vst [vmem:[#allocation2 + $0x28] sm:$0x1] %v86_v53 }
  0x20   :  { %1097 = vmatprep.subr.mxu1 %v1439_v1  ;;  %1166 = vmatpush3.msra.mxu0 %v1567_v10  ;;  %56 = vst [vmem:[#allocation2 + $0x9] sm:$0x1] %v55_v21  ;;  %v129_v22 = vld [vmem:[#allocation2] sm:$0xff]  ;;  %s99_s27 = scalar_lea.vmem %s2012_s1, %s917_s21 }
  0x21   :  { %1098 = vmatpush3.msra.mxu1 %v1576_v11  ;;  %1167 = vmatprep.subr.mxu0 %v1439_v1  ;;  %v59_v29 = vld [vmem:[%s58_s16] sm:$0x1]  ;;  %s76_s30 = scalar_lea.vmem %s2012_s1, %s912_s2 }
  0x22   :  { %1099 = vmatprep.subr.mxu1 %v1439_v1  ;;  %1168 = vmatpush3.msra.mxu0 %v1576_v11  ;;  %61 = vst [vmem:[#allocation2 + $0x10] sm:$0x1] %v59_v29  ;;  %v77_v45 = vld [vmem:[%s76_s30] sm:$0x1]  ;;  %s918_s30 = sld [smem:[#allocation5 + $0xe]]  ;;  %s108_s3 = scalar_lea.vmem %s2012_s1, %s919_s9 }
  0x23   :  { %1100 = vmatpush3.msra.mxu1 %v1585_v12  ;;  %1169 = vmatprep.subr.mxu0 %v1439_v1  ;;  %79 = vst [vmem:[#allocation2 + $0x20] sm:$0x1] %v77_v45  ;;  %v356_v47 = vld [vmem:[#allocation2 + $0x18] sm:$0xff]  ;;  %v91_v54 = vld [vmem:[%s90_s17] sm:$0x1] }
  0x24   :  { %1101 = vmatprep.subr.mxu1 %v1439_v1  ;;  %1170 = vmatpush3.msra.mxu0 %v1585_v12  ;;  %s81_s11 = scalar_lea.vmem %s2012_s1, %s913_s6  ;;  %92 = vst [vmem:[#allocation2 + $0x29] sm:$0x1] %v91_v54  ;;  %v95_v62 = vld [vmem:[%s94_s24] sm:$0x1] }
  0x25   :  { %1102 = vmatpush3.msra.mxu1 %v1594_v13  ;;  %1171 = vmatprep.subr.mxu0 %v1439_v1  ;;  %v82_v46 = vld [vmem:[%s81_s11] sm:$0x1]  ;;  %97 = vst [vmem:[#allocation2 + $0x30] sm:$0x1] %v95_v62 }
  0x26   :  { %1103 = vmatprep.subr.mxu1 %v1439_v1  ;;  %1172 = vmatpush3.msra.mxu0 %v1594_v13  ;;  %83 = vst [vmem:[#allocation2 + $0x21] sm:$0x1] %v82_v46  ;;  %v100_v63 = vld [vmem:[%s99_s27] sm:$0x1] }
  0x27   :  { %1104 = vmatpush3.msra.mxu1 %v1603_v14  ;;  %1173 = vmatprep.subr.mxu0 %v1439_v1  ;;  %v204_v31 = vld [vmem:[#allocation2 + $0x8] sm:$0xff]  ;;  %101 = vst [vmem:[#allocation2 + $0x31] sm:$0x1] %v100_v63  ;;  %v757_v8 = vld [vmem:[%s2015_s4 + $0x60] sm:$0xff] }
  0x28   :  { %1105 = vmatprep.subr.mxu1 %v1439_v1  ;;  %1174 = vmatpush3.msra.mxu0 %v1603_v14  ;;  %v745_v20 = vld [vmem:[%s2015_s4] sm:$0xff]  ;;  %s103_s0 = scalar_lea.vmem %s2012_s1, %s918_s30 }
  0x29   :  { %1106 = vmatpush3.msra.mxu1 %v1612_v15  ;;  %1175 = vmatprep.subr.mxu0 %v1439_v1  ;;  %v280_v39 = vld [vmem:[#allocation2 + $0x10] sm:$0xff]  ;;  %v104_v21 = vld [vmem:[%s103_s0] sm:$0x1] }
  0x2a   :  { %1107 = vmatprep.subr.mxu1 %v1439_v1  ;;  %1176 = vmatpush3.msra.mxu0 %v1612_v15  ;;  %106 = vst [vmem:[#allocation2 + $0x38] sm:$0x1] %v104_v21  ;;  %v920_v30 = vld [vmem:[%s2016_s5] ss:$0 sm:$0xff] }
  0x2b   :  { %1108 = vmatpush3.msra.mxu1 %v1621_v16  ;;  %1177 = vmatprep.subr.mxu0 %v1439_v1 }
  0x2c   :  { %1109 = vmatprep.subr.mxu1 %v1439_v1  ;;  %1178 = vmatpush3.msra.mxu0 %v1621_v16 }
  0x2d   :  { %1110 = vmatpush3.msra.mxu1 %v1630_v17  ;;  %1179 = vmatprep.subr.mxu0 %v1439_v1  ;;  %v432_v55 = vld [vmem:[#allocation2 + $0x20] sm:$0xff] }
  0x2e   :  { %1111 = vmatprep.subr.mxu1 %v1439_v1  ;;  %1180 = vmatpush3.msra.mxu0 %v1630_v17 }
  0x2f   :  { %1112 = vmatpush3.msra.mxu1 %v1639_v18  ;;  %1181 = vmatprep.subr.mxu0 %v1439_v1 }
  0x30   :  { %1114 = vmatmul.mubr.f32.vlgmr.msra.gmra.mxu1 %v128_v19  ;;  %1116 = vmatprep.subr.mxu1 %v1439_v1  ;;  %v746_v19 = vld [vmem:[%s2015_s4 + $0x8] sm:$0xff] }
  0x31   :  { %1117 = vmatpush3.msra.mxu1 %v1492_v0  ;;  %1148 = vmatprep.mubr.msk.f32.mxu1 %vm1440_vm0, %v1439_v1 }
  0x32   :  { %1118 = vmatprep.subr.mxu1 %v1439_v1  ;;  %1182 = vmatpush3.msra.mxu0 %v1639_v18 }
  0x33   :  { %1119 = vmatpush3.msra.mxu1 %v1506_v2  ;;  %1183 = vmatprep.mubr.msk.f32.mxu0 %vm1440_vm0, %v1439_v1 }
  0x34   :  { %1120 = vmatprep.subr.mxu1 %v1439_v1  ;;  %1221 = vmatprep.subr.mxu0 %v1439_v1 }
  0x35   :  { %1121 = vmatpush3.msra.mxu1 %v1516_v3 }
  0x36   :  { %1122 = vmatprep.subr.mxu1 %v1439_v1 }
  0x37   :  { %1123 = vmatpush3.msra.mxu1 %v1525_v4 }
  0x38   :  { %1124 = vmatprep.subr.mxu1 %v1439_v1 }
  0x39   :  { %1125 = vmatpush3.msra.mxu1 %v1534_v5 }
  0x3a   :  { %1126 = vmatprep.subr.mxu1 %v1439_v1 }
  0x3b   :  { %1127 = vmatpush3.msra.mxu1 %v1549_v7 }
  0x3c   :  { %1128 = vmatprep.subr.mxu1 %v1439_v1 }
  0x3d   :  { %1129 = vmatpush3.msra.mxu1 %v1558_v9 }
  0x3e   :  { %1130 = vmatprep.subr.mxu1 %v1439_v1 }
  0x3f   :  { %1131 = vmatpush3.msra.mxu1 %v1567_v10 }
  0x40   :  { %1132 = vmatprep.subr.mxu1 %v1439_v1 }
  0x41   :  { %1133 = vmatpush3.msra.mxu1 %v1576_v11 }
  0x42   :  { %1134 = vmatprep.subr.mxu1 %v1439_v1 }
  0x43   :  { %1135 = vmatpush3.msra.mxu1 %v1585_v12 }
  0x44   :  { %1136 = vmatprep.subr.mxu1 %v1439_v1 }
  0x45   :  { %1137 = vmatpush3.msra.mxu1 %v1594_v13 }
  0x46   :  { %1138 = vmatprep.subr.mxu1 %v1439_v1 }
  0x47   :  { %1139 = vmatpush3.msra.mxu1 %v1603_v14 }
  0x48   :  { %1140 = vmatprep.subr.mxu1 %v1439_v1 }
  0x49   :  { %1141 = vmatpush3.msra.mxu1 %v1612_v15 }
  0x4a   :  { %1142 = vmatprep.subr.mxu1 %v1439_v1 }
  0x4b   :  { %1143 = vmatpush3.msra.mxu1 %v1621_v16 }
  0x4c   :  { %1144 = vmatprep.subr.mxu1 %v1439_v1 }
  0x4d   :  { %1145 = vmatpush3.msra.mxu1 %v1630_v17 }
  0x4e   :  { %1146 = vmatprep.subr.mxu1 %v1439_v1 }
  0x4f   :  { %1147 = vmatpush3.msra.mxu1 %v1639_v18 }
  0x50   :  { %1186 = vmatprep.subr.mxu1 %v1439_v1 }
  0xf0   :  { %v196_v24 = vpop.f32.mrf.mxu1 }
  0xf1   :  { %v200_v25 = vadd.f32 %v196_v24, %v129_v22  ;;  %v109_v22 = vld [vmem:[%s108_s3] sm:$0x1]  ;;  %v584_v24 = vld [vmem:[#allocation2 + $0x30] sm:$0xff] }
  0xf2   :  { %v1115_v26 = vpop.f32.mrf.mxu1  ;;  %110 = vst [vmem:[#allocation2 + $0x39] sm:$0x1] %v109_v22 }
  0xf3   :  { %v201_v27 = vadd.f32 %v200_v25, %v1699_v23 }
  0xf5   :  { %1408 = vtanh.f32 %v201_v27 }
 0x102   :  { %v1702_v28 = vpop.eup %1408 }
 0x103   :  { %1149 = vmatmul.mubr.f32.vlgmr.msra.gmra.mxu1 %v1702_v28 }
 0x104   :  { %1187 = vmatpush3.msra.mxu1 %v1492_v0  ;;  %1218 = vmatprep.mubr.msk.f32.mxu1 %vm1440_vm0, %v1439_v1 }
 0x105   :  { %1188 = vmatprep.subr.mxu1 %v1439_v1 }
 0x106   :  { %1189 = vmatpush3.msra.mxu1 %v1506_v2 }
 0x107   :  { %1190 = vmatprep.subr.mxu1 %v1439_v1 }
 0x108   :  { %1191 = vmatpush3.msra.mxu1 %v1516_v3 }
 0x109   :  { %1192 = vmatprep.subr.mxu1 %v1439_v1 }
 0x10a   :  { %1193 = vmatpush3.msra.mxu1 %v1525_v4 }
 0x10b   :  { %1194 = vmatprep.subr.mxu1 %v1439_v1 }
 0x10c   :  { %1195 = vmatpush3.msra.mxu1 %v1534_v5 }
 0x10d   :  { %1196 = vmatprep.subr.mxu1 %v1439_v1 }
 0x10e   :  { %1197 = vmatpush3.msra.mxu1 %v1549_v7 }
 0x10f   :  { %1198 = vmatprep.subr.mxu1 %v1439_v1 }
 0x110   :  { %1199 = vmatpush3.msra.mxu1 %v1558_v9 }
 0x111   :  { %1200 = vmatprep.subr.mxu1 %v1439_v1 }
 0x112   :  { %1201 = vmatpush3.msra.mxu1 %v1567_v10 }
 0x113   :  { %1202 = vmatprep.subr.mxu1 %v1439_v1 }
 0x114   :  { %1203 = vmatpush3.msra.mxu1 %v1576_v11 }
 0x115   :  { %1204 = vmatprep.subr.mxu1 %v1439_v1 }
 0x116   :  { %1205 = vmatpush3.msra.mxu1 %v1585_v12 }
 0x117   :  { %1206 = vmatprep.subr.mxu1 %v1439_v1 }
 0x118   :  { %1207 = vmatpush3.msra.mxu1 %v1594_v13 }
 0x119   :  { %1208 = vmatprep.subr.mxu1 %v1439_v1 }
 0x11a   :  { %1209 = vmatpush3.msra.mxu1 %v1603_v14 }
 0x11b   :  { %1210 = vmatprep.subr.mxu1 %v1439_v1 }
 0x11c   :  { %1211 = vmatpush3.msra.mxu1 %v1612_v15 }
 0x11d   :  { %1212 = vmatprep.subr.mxu1 %v1439_v1 }
 0x11e   :  { %1213 = vmatpush3.msra.mxu1 %v1621_v16 }
 0x11f   :  { %1214 = vmatprep.subr.mxu1 %v1439_v1 }
 0x120   :  { %1215 = vmatpush3.msra.mxu1 %v1630_v17 }
 0x121   :  { %1216 = vmatprep.subr.mxu1 %v1439_v1 }
 0x122   :  { %1217 = vmatpush3.msra.mxu1 %v1639_v18 }
 0x123   :  { %1256 = vmatprep.subr.mxu1 %v1439_v1 }
 0x1c3   :  { %v271_v32 = vpop.f32.mrf.mxu1 }
 0x1c4   :  { %v275_v33 = vadd.f32 %v271_v32, %v204_v31 }
 0x1c5   :  { %v1150_v34 = vpop.f32.mrf.mxu1 }
 0x1c6   :  { %v276_v35 = vadd.f32 %v275_v33, %v1699_v23 }
 0x1c8   :  { %1410 = vtanh.f32 %v276_v35 }
 0x1d5   :  { %v1746_v36 = vpop.eup %1410 }
 0x1d6   :  { %1184 = vmatmul.mubr.f32.vlgmr.msra.gmra.mxu0 %v1746_v36 }
 0x1d7   :  { %1222 = vmatpush3.msra.mxu0 %v1492_v0  ;;  %1253 = vmatprep.mubr.msk.f32.mxu0 %vm1440_vm0, %v1439_v1 }
 0x1d8   :  { %1223 = vmatprep.subr.mxu0 %v1439_v1 }
 0x1d9   :  { %1224 = vmatpush3.msra.mxu0 %v1506_v2 }
 0x1da   :  { %1225 = vmatprep.subr.mxu0 %v1439_v1 }
 0x1db   :  { %1226 = vmatpush3.msra.mxu0 %v1516_v3 }
 0x1dc   :  { %1227 = vmatprep.subr.mxu0 %v1439_v1 }
 0x1dd   :  { %1228 = vmatpush3.msra.mxu0 %v1525_v4 }
 0x1de   :  { %1229 = vmatprep.subr.mxu0 %v1439_v1 }
 0x1df   :  { %1230 = vmatpush3.msra.mxu0 %v1534_v5 }
 0x1e0   :  { %1231 = vmatprep.subr.mxu0 %v1439_v1 }
 0x1e1   :  { %1232 = vmatpush3.msra.mxu0 %v1549_v7 }
 0x1e2   :  { %1233 = vmatprep.subr.mxu0 %v1439_v1 }
 0x1e3   :  { %1234 = vmatpush3.msra.mxu0 %v1558_v9 }
 0x1e4   :  { %1235 = vmatprep.subr.mxu0 %v1439_v1 }
 0x1e5   :  { %1236 = vmatpush3.msra.mxu0 %v1567_v10 }
 0x1e6   :  { %1237 = vmatprep.subr.mxu0 %v1439_v1 }
 0x1e7   :  { %1238 = vmatpush3.msra.mxu0 %v1576_v11 }
 0x1e8   :  { %1239 = vmatprep.subr.mxu0 %v1439_v1 }
 0x1e9   :  { %1240 = vmatpush3.msra.mxu0 %v1585_v12 }
 0x1ea   :  { %1241 = vmatprep.subr.mxu0 %v1439_v1 }
 0x1eb   :  { %1242 = vmatpush3.msra.mxu0 %v1594_v13 }
 0x1ec   :  { %1243 = vmatprep.subr.mxu0 %v1439_v1 }
 0x1ed   :  { %1244 = vmatpush3.msra.mxu0 %v1603_v14 }
 0x1ee   :  { %1245 = vmatprep.subr.mxu0 %v1439_v1 }
 0x1ef   :  { %1246 = vmatpush3.msra.mxu0 %v1612_v15 }
 0x1f0   :  { %1247 = vmatprep.subr.mxu0 %v1439_v1 }
 0x1f1   :  { %1248 = vmatpush3.msra.mxu0 %v1621_v16 }
 0x1f2   :  { %1249 = vmatprep.subr.mxu0 %v1439_v1 }
 0x1f3   :  { %1250 = vmatpush3.msra.mxu0 %v1630_v17 }
 0x1f4   :  { %1251 = vmatprep.subr.mxu0 %v1439_v1 }
 0x1f5   :  { %1252 = vmatpush3.msra.mxu0 %v1639_v18 }
 0x1f6   :  { %1291 = vmatprep.subr.mxu0 %v1439_v1 }
 0x296   :  { %v347_v40 = vpop.f32.mrf.mxu0 }
 0x297   :  { %v351_v41 = vadd.f32 %v347_v40, %v280_v39 }
 0x298   :  { %v1185_v42 = vpop.f32.mrf.mxu0 }
 0x299   :  { %v352_v43 = vadd.f32 %v351_v41, %v1699_v23 }
 0x29b   :  { %1412 = vtanh.f32 %v352_v43  ;;  %v660_v43 = vld [vmem:[#allocation2 + $0x38] sm:$0xff] }
 0x2a8   :  { %v1790_v44 = vpop.eup %1412 }
 0x2a9   :  { %1219 = vmatmul.mubr.f32.vlgmr.msra.gmra.mxu1 %v1790_v44 }
 0x2aa   :  { %1257 = vmatpush3.msra.mxu1 %v1492_v0  ;;  %1288 = vmatprep.mubr.msk.f32.mxu1 %vm1440_vm0, %v1439_v1 }
 0x2ab   :  { %1258 = vmatprep.subr.mxu1 %v1439_v1 }
 0x2ac   :  { %1259 = vmatpush3.msra.mxu1 %v1506_v2 }
 0x2ad   :  { %1260 = vmatprep.subr.mxu1 %v1439_v1 }
 0x2ae   :  { %1261 = vmatpush3.msra.mxu1 %v1516_v3 }
 0x2af   :  { %1262 = vmatprep.subr.mxu1 %v1439_v1 }
 0x2b0   :  { %1263 = vmatpush3.msra.mxu1 %v1525_v4 }
 0x2b1   :  { %1264 = vmatprep.subr.mxu1 %v1439_v1 }
 0x2b2   :  { %1265 = vmatpush3.msra.mxu1 %v1534_v5 }
 0x2b3   :  { %1266 = vmatprep.subr.mxu1 %v1439_v1 }
 0x2b4   :  { %1267 = vmatpush3.msra.mxu1 %v1549_v7 }
 0x2b5   :  { %1268 = vmatprep.subr.mxu1 %v1439_v1 }
 0x2b6   :  { %1269 = vmatpush3.msra.mxu1 %v1558_v9 }
 0x2b7   :  { %1270 = vmatprep.subr.mxu1 %v1439_v1 }
 0x2b8   :  { %1271 = vmatpush3.msra.mxu1 %v1567_v10 }
 0x2b9   :  { %1272 = vmatprep.subr.mxu1 %v1439_v1 }
 0x2ba   :  { %1273 = vmatpush3.msra.mxu1 %v1576_v11 }
 0x2bb   :  { %1274 = vmatprep.subr.mxu1 %v1439_v1 }
 0x2bc   :  { %1275 = vmatpush3.msra.mxu1 %v1585_v12 }
 0x2bd   :  { %1276 = vmatprep.subr.mxu1 %v1439_v1 }
 0x2be   :  { %1277 = vmatpush3.msra.mxu1 %v1594_v13 }
 0x2bf   :  { %1278 = vmatprep.subr.mxu1 %v1439_v1 }
 0x2c0   :  { %1279 = vmatpush3.msra.mxu1 %v1603_v14 }
 0x2c1   :  { %1280 = vmatprep.subr.mxu1 %v1439_v1 }
 0x2c2   :  { %1281 = vmatpush3.msra.mxu1 %v1612_v15 }
 0x2c3   :  { %1282 = vmatprep.subr.mxu1 %v1439_v1 }
 0x2c4   :  { %1283 = vmatpush3.msra.mxu1 %v1621_v16 }
 0x2c5   :  { %1284 = vmatprep.subr.mxu1 %v1439_v1 }
 0x2c6   :  { %1285 = vmatpush3.msra.mxu1 %v1630_v17 }
 0x2c7   :  { %1286 = vmatprep.subr.mxu1 %v1439_v1 }
 0x2c8   :  { %1287 = vmatpush3.msra.mxu1 %v1639_v18 }
 0x2c9   :  { %1326 = vmatprep.subr.mxu1 %v1439_v1 }
 0x369   :  { %v423_v48 = vpop.f32.mrf.mxu1 }
 0x36a   :  { %v427_v49 = vadd.f32 %v423_v48, %v356_v47 }
 0x36b   :  { %v1220_v50 = vpop.f32.mrf.mxu1 }
 0x36c   :  { %v428_v51 = vadd.f32 %v427_v49, %v1699_v23 }
 0x36e   :  { %1414 = vtanh.f32 %v428_v51 }
 0x37b   :  { %v1834_v52 = vpop.eup %1414 }
 0x37c   :  { %1254 = vmatmul.mubr.f32.vlgmr.msra.gmra.mxu0 %v1834_v52 }
 0x37d   :  { %1292 = vmatpush3.msra.mxu0 %v1492_v0  ;;  %1323 = vmatprep.mubr.msk.f32.mxu0 %vm1440_vm0, %v1439_v1 }
 0x37e   :  { %1293 = vmatprep.subr.mxu0 %v1439_v1 }
 0x37f   :  { %1294 = vmatpush3.msra.mxu0 %v1506_v2 }
 0x380   :  { %1295 = vmatprep.subr.mxu0 %v1439_v1 }
 0x381   :  { %1296 = vmatpush3.msra.mxu0 %v1516_v3 }
 0x382   :  { %1297 = vmatprep.subr.mxu0 %v1439_v1 }
 0x383   :  { %1298 = vmatpush3.msra.mxu0 %v1525_v4 }
 0x384   :  { %1299 = vmatprep.subr.mxu0 %v1439_v1 }
 0x385   :  { %1300 = vmatpush3.msra.mxu0 %v1534_v5 }
 0x386   :  { %1301 = vmatprep.subr.mxu0 %v1439_v1 }
 0x387   :  { %1302 = vmatpush3.msra.mxu0 %v1549_v7 }
 0x388   :  { %1303 = vmatprep.subr.mxu0 %v1439_v1 }
 0x389   :  { %1304 = vmatpush3.msra.mxu0 %v1558_v9 }
 0x38a   :  { %1305 = vmatprep.subr.mxu0 %v1439_v1 }
 0x38b   :  { %1306 = vmatpush3.msra.mxu0 %v1567_v10 }
 0x38c   :  { %1307 = vmatprep.subr.mxu0 %v1439_v1 }
 0x38d   :  { %1308 = vmatpush3.msra.mxu0 %v1576_v11 }
 0x38e   :  { %1309 = vmatprep.subr.mxu0 %v1439_v1 }
 0x38f   :  { %1310 = vmatpush3.msra.mxu0 %v1585_v12 }
 0x390   :  { %1311 = vmatprep.subr.mxu0 %v1439_v1 }
 0x391   :  { %1312 = vmatpush3.msra.mxu0 %v1594_v13 }
 0x392   :  { %1313 = vmatprep.subr.mxu0 %v1439_v1 }
 0x393   :  { %1314 = vmatpush3.msra.mxu0 %v1603_v14 }
 0x394   :  { %1315 = vmatprep.subr.mxu0 %v1439_v1 }
 0x395   :  { %1316 = vmatpush3.msra.mxu0 %v1612_v15 }
 0x396   :  { %1317 = vmatprep.subr.mxu0 %v1439_v1 }
 0x397   :  { %1318 = vmatpush3.msra.mxu0 %v1621_v16 }
 0x398   :  { %1319 = vmatprep.subr.mxu0 %v1439_v1 }
 0x399   :  { %1320 = vmatpush3.msra.mxu0 %v1630_v17 }
 0x39a   :  { %1321 = vmatprep.subr.mxu0 %v1439_v1 }
 0x39b   :  { %1322 = vmatpush3.msra.mxu0 %v1639_v18 }
 0x39c   :  { %1361 = vmatprep.subr.mxu0 %v760_v61 }
 0x43c   :  { %v499_v56 = vpop.f32.mrf.mxu0 }
 0x43d   :  { %v503_v57 = vadd.f32 %v499_v56, %v432_v55 }
 0x43e   :  { %v1255_v58 = vpop.f32.mrf.mxu0 }
 0x43f   :  { %v504_v59 = vadd.f32 %v503_v57, %v1699_v23 }
 0x441   :  { %1416 = vtanh.f32 %v504_v59 }
 0x44e   :  { %v1877_v60 = vpop.eup %1416 }
 0x44f   :  { %1289 = vmatmul.mubr.f32.vlgmr.msra.gmra.mxu1 %v1877_v60 }
 0x450   :  { %1327 = vmatpush3.msra.mxu1 %v1492_v0  ;;  %1358 = vmatprep.mubr.msk.f32.mxu1 %vm1440_vm0, %v1439_v1  ;;  %v508_v0 = vld [vmem:[#allocation2 + $0x28] sm:$0xff] }
 0x451   :  { %1328 = vmatprep.subr.mxu1 %v1439_v1 }
 0x452   :  { %1329 = vmatpush3.msra.mxu1 %v1506_v2 }
 0x453   :  { %1330 = vmatprep.subr.mxu1 %v1439_v1 }
 0x454   :  { %1331 = vmatpush3.msra.mxu1 %v1516_v3 }
 0x455   :  { %1332 = vmatprep.subr.mxu1 %v1439_v1 }
 0x456   :  { %1333 = vmatpush3.msra.mxu1 %v1525_v4 }
 0x457   :  { %1334 = vmatprep.subr.mxu1 %v1439_v1 }
 0x458   :  { %1335 = vmatpush3.msra.mxu1 %v1534_v5 }
 0x459   :  { %1336 = vmatprep.subr.mxu1 %v1439_v1 }
 0x45a   :  { %1337 = vmatpush3.msra.mxu1 %v1549_v7  ;;  %v758_v7 = vld [vmem:[%s2015_s4 + $0x68] sm:$0xff] }
 0x45b   :  { %1338 = vmatprep.subr.mxu1 %v1439_v1 }
 0x45c   :  { %1339 = vmatpush3.msra.mxu1 %v1558_v9  ;;  %v756_v9 = vld [vmem:[%s2015_s4 + $0x58] sm:$0xff] }
 0x45d   :  { %1340 = vmatprep.subr.mxu1 %v1439_v1 }
 0x45e   :  { %1341 = vmatpush3.msra.mxu1 %v1567_v10  ;;  %v755_v10 = vld [vmem:[%s2015_s4 + $0x50] sm:$0xff] }
 0x45f   :  { %1342 = vmatprep.subr.mxu1 %v1439_v1 }
 0x460   :  { %1343 = vmatpush3.msra.mxu1 %v1576_v11  ;;  %v754_v11 = vld [vmem:[%s2015_s4 + $0x48] sm:$0xff] }
 0x461   :  { %1344 = vmatprep.subr.mxu1 %v1439_v1 }
 0x462   :  { %1345 = vmatpush3.msra.mxu1 %v1585_v12  ;;  %v753_v12 = vld [vmem:[%s2015_s4 + $0x40] sm:$0xff] }
 0x463   :  { %1346 = vmatprep.subr.mxu1 %v1439_v1 }
 0x464   :  { %1347 = vmatpush3.msra.mxu1 %v1594_v13  ;;  %v752_v13 = vld [vmem:[%s2015_s4 + $0x38] sm:$0xff] }
 0x465   :  { %1348 = vmatprep.subr.mxu1 %v1439_v1 }
 0x466   :  { %1349 = vmatpush3.msra.mxu1 %v1603_v14  ;;  %v751_v14 = vld [vmem:[%s2015_s4 + $0x30] sm:$0xff] }
 0x467   :  { %1350 = vmatprep.subr.mxu1 %v1439_v1 }
 0x468   :  { %1351 = vmatpush3.msra.mxu1 %v1612_v15  ;;  %v750_v15 = vld [vmem:[%s2015_s4 + $0x28] sm:$0xff] }
 0x469   :  { %1352 = vmatprep.subr.mxu1 %v1439_v1 }
 0x46a   :  { %1353 = vmatpush3.msra.mxu1 %v1621_v16  ;;  %v749_v16 = vld [vmem:[%s2015_s4 + $0x20] sm:$0xff] }
 0x46b   :  { %1354 = vmatprep.subr.mxu1 %v1439_v1 }
 0x46c   :  { %1355 = vmatpush3.msra.mxu1 %v1630_v17  ;;  %v748_v17 = vld [vmem:[%s2015_s4 + $0x18] sm:$0xff] }
 0x46d   :  { %1356 = vmatprep.subr.mxu1 %v1439_v1 }
 0x46e   :  { %1357 = vmatpush3.msra.mxu1 %v1639_v18  ;;  %v747_v18 = vld [vmem:[%s2015_s4 + $0x10] sm:$0xff] }
 0x50f   :  { %v575_v1 = vpop.f32.mrf.mxu1 }
 0x510   :  { %v579_v2 = vadd.f32 %v575_v1, %v508_v0 }
 0x511   :  { %v1290_v3 = vpop.f32.mrf.mxu1 }
 0x512   :  { %v580_v4 = vadd.f32 %v579_v2, %v1699_v23 }
 0x514   :  { %1418 = vtanh.f32 %v580_v4 }
 0x521   :  { %v1419_v5 = vpop.eup %1418 }
 0x522   :  { %1324 = vmatmul.mubr.f32.vlgmr.msra.gmra.mxu0 %v1419_v5 }
 0x523   :  { %1362 = vmatpush3.msra.mxu0 %v760_v61  ;;  %1393 = vmatprep.mubr.f32.mxu0 %v1702_v28 }
 0x524   :  { %1363 = vmatprep.subr.mxu0 %v759_v6 }
 0x525   :  { %1364 = vmatpush3.msra.mxu0 %v759_v6 }
 0x526   :  { %1365 = vmatprep.subr.mxu0 %v758_v7 }
 0x527   :  { %1366 = vmatpush3.msra.mxu0 %v758_v7 }
 0x528   :  { %1367 = vmatprep.subr.mxu0 %v757_v8 }
 0x529   :  { %1368 = vmatpush3.msra.mxu0 %v757_v8 }
 0x52a   :  { %1369 = vmatprep.subr.mxu0 %v756_v9 }
 0x52b   :  { %1370 = vmatpush3.msra.mxu0 %v756_v9 }
 0x52c   :  { %1371 = vmatprep.subr.mxu0 %v755_v10 }
 0x52d   :  { %1372 = vmatpush3.msra.mxu0 %v755_v10 }
 0x52e   :  { %1373 = vmatprep.subr.mxu0 %v754_v11 }
 0x52f   :  { %1374 = vmatpush3.msra.mxu0 %v754_v11 }
 0x530   :  { %1375 = vmatprep.subr.mxu0 %v753_v12 }
 0x531   :  { %1376 = vmatpush3.msra.mxu0 %v753_v12 }
 0x532   :  { %1377 = vmatprep.subr.mxu0 %v752_v13 }
 0x533   :  { %1378 = vmatpush3.msra.mxu0 %v752_v13 }
 0x534   :  { %1379 = vmatprep.subr.mxu0 %v751_v14 }
 0x535   :  { %1380 = vmatpush3.msra.mxu0 %v751_v14 }
 0x536   :  { %1381 = vmatprep.subr.mxu0 %v750_v15 }
 0x537   :  { %1382 = vmatpush3.msra.mxu0 %v750_v15 }
 0x538   :  { %1383 = vmatprep.subr.mxu0 %v749_v16 }
 0x539   :  { %1384 = vmatpush3.msra.mxu0 %v749_v16 }
 0x53a   :  { %1385 = vmatprep.subr.mxu0 %v748_v17 }
 0x53b   :  { %1386 = vmatpush3.msra.mxu0 %v748_v17 }
 0x53c   :  { %1387 = vmatprep.subr.mxu0 %v747_v18 }
 0x53d   :  { %1388 = vmatpush3.msra.mxu0 %v747_v18 }
 0x53e   :  { %1389 = vmatprep.subr.mxu0 %v746_v19 }
 0x53f   :  { %1390 = vmatpush3.msra.mxu0 %v746_v19 }
 0x540   :  { %1391 = vmatprep.subr.mxu0 %v745_v20 }
 0x541   :  { %1392 = vmatpush3.msra.mxu0 %v745_v20 }
 0x542   :  { %1394 = vmatmul.mubr.f32.vlgmr.msra.gmra.mxu0 %v1746_v36 }
 0x543   :  { %1396 = vmatprep.mubr.f32.mxu0 %v1790_v44 }
 0x546   :  { %1397 = vmatmul.mubr.f32.gmra.mxu0 %v1834_v52 }
 0x547   :  { %1399 = vmatprep.mubr.f32.mxu0 %v1877_v60 }
 0x54a   :  { %1400 = vmatmul.mubr.f32.gmra.mxu0 %v1419_v5 }
 0x5e2   :  { %v651_v25 = vpop.f32.mrf.mxu0 }
 0x5e3   :  { %v655_v26 = vadd.f32 %v651_v25, %v584_v24 }
 0x5e4   :  { %v1325_v27 = vpop.f32.mrf.mxu0 }
 0x5e5   :  { %v656_v28 = vadd.f32 %v655_v26, %v1699_v23 }
 0x5e7   :  { %1420 = vtanh.f32 %v656_v28 }
 0x5f4   :  { %v1421_v29 = vpop.eup %1420 }
 0x5f5   :  { %1359 = vmatmul.mubr.f32.vlgmr.msra.gmra.mxu1 %v1421_v29  ;;  %1402 = vmatprep.mubr.f32.mxu0 %v1421_v29 }
 0x602   :  { %v1395_v31 = vpop.f32.mrf.mxu0 }
 0x603   :  { %v840_v32 = vadd.f32 %v1395_v31, %v920_v30 }
 0x604   :  { %v834_v33 = vpop.f32.mrf.mxu0 }
 0x605   :  { %874 = vst [vmem:[%s2018_s7 + $0x8] sm:$0xff] %v840_v32  ;;  %v835_v34 = vadd.f32 %v920_v30, %v834_v33 }
 0x606   :  { %v1398_v35 = vpop.f32.mrf.mxu0 }
 0x607   :  { %873 = vst [vmem:[%s2018_s7] sm:$0xff] %v835_v34  ;;  %v850_v36 = vadd.f32 %v1398_v35, %v920_v30 }
 0x608   :  { %v844_v37 = vpop.f32.mrf.mxu0 }
 0x609   :  { %876 = vst [vmem:[%s2018_s7 + $0x18] sm:$0xff] %v850_v36  ;;  %v845_v38 = vadd.f32 %v920_v30, %v844_v37 }
 0x60a   :  { %v1401_v39 = vpop.f32.mrf.mxu0 }
 0x60b   :  { %875 = vst [vmem:[%s2018_s7 + $0x10] sm:$0xff] %v845_v38  ;;  %v860_v40 = vadd.f32 %v1401_v39, %v920_v30 }
 0x60c   :  { %v854_v41 = vpop.f32.mrf.mxu0 }
 0x60d   :  { %878 = vst [vmem:[%s2018_s7 + $0x28] sm:$0xff] %v860_v40  ;;  %v855_v42 = vadd.f32 %v920_v30, %v854_v41 }
 0x60f   :  { %877 = vst [vmem:[%s2018_s7 + $0x20] sm:$0xff] %v855_v42 }
 0x6b5   :  { %v727_v44 = vpop.f32.mrf.mxu1 }
 0x6b6   :  { %v731_v45 = vadd.f32 %v727_v44, %v660_v43 }
 0x6b7   :  { %v1360_v46 = vpop.f32.mrf.mxu1 }
 0x6b8   :  { %v732_v47 = vadd.f32 %v731_v45, %v1699_v23 }
 0x6ba   :  { %1422 = vtanh.f32 %v732_v47 }
 0x6c7   :  { %v1423_v48 = vpop.eup %1422 }
 0x6c8   :  { %736 = vst [vmem:[%s2019_s8] sm:$0xff] %v1423_v48  ;;  %1403 = vmatmul.mubr.f32.gmra.mxu0 %v1423_v48 }
 0x788   :  { %v1404_v49 = vpop.f32.mrf.mxu0 }
 0x789   :  { %v870_v50 = vadd.f32 %v1404_v49, %v920_v30 }
 0x78a   :  { %v864_v51 = vpop.f32.mrf.mxu0 }
 0x78b   :  { %880 = vst [vmem:[%s2018_s7 + $0x38] sm:$0xff] %v870_v50  ;;  %v865_v52 = vadd.f32 %v920_v30, %v864_v51 }
 0x78d   :  { %879 = vst [vmem:[%s2018_s7 + $0x30] sm:$0xff] %v865_v52 }

</bundles_post_ra>
